<compile_context>
chip_gen: v6e
topology: v6e:2x2x1
jax: 0.10.0
libtpu: 0.0.40
codegen_flags: <defaults>
</compile_context>

<pallas_src>
import functools
import numpy as np

import jax
import jax.numpy as jnp
from jax import lax
from jax.experimental import pallas as pl
from jax.experimental.pallas import tpu as pltpu

BN_EPS = 1e-5
ACT_DTYPE = jnp.bfloat16          # inter-layer activation dtype

# Demo scaling: 1/8 of the real ResNet34 widths (same topology / ops / data
# flow).  WIDTH_DIV = 1 reproduces the full-width model.
WIDTH_DIV = 8

TM_CAP = 1024                     # M tile cap
TN_CAP = 256                      # N tile (never below 128; 256 fills the MXU)
TK_CAP = 2048                     # K tile cap (im2col/matmul path)
TCK_CAP = 1024                    # Cin tile cap (tap-conv path)
VMEM_LIMIT = 48 * 1024 * 1024     # explicit scoped VMEM (fits v5e/v6e/v7x)


def _round_up(x, m):
    return (x + m - 1) // m * m


def _pick_tile(dim, max_tile):
    """Largest multiple of 128 (<= max_tile) dividing round_up(dim, 128)."""
    r = _round_up(dim, 128)
    best = 128
    t = 256
    while t <= min(max_tile, r):
        if r % t == 0:
            best = t
        t += 128
    return best, r


def _largest_div_mult128(dim, cap):
    """Largest multiple of 128 <= cap that divides `dim` (dim % 128 == 0)."""
    best = 128
    t = 128
    while t <= min(cap, dim):
        if dim % t == 0:
            best = t
        t += 128
    return best


def _pad2(x, rows, cols):
    if rows or cols:
        x = jnp.pad(x, ((0, rows), (0, cols)))
    return x


def _fold_bn(bias, bn, cout):
    b = bias if bias is not None else jnp.zeros((cout,), jnp.float32)
    if bn is not None:
        s = bn['gamma'] * lax.rsqrt(bn['var'] + BN_EPS)
        return s, (b - bn['mean']) * s + bn['beta']
    return jnp.ones((cout,), jnp.float32), b


# -----------------------------------------------------------------------------
# Pallas kernel 1: tiled bf16 matmul (f32 accumulation) with fused epilogue
#   out = [relu]( (A @ W) * scale + shift [+ residual] )
# Used for strided convs (via im2col) and 1x1 convs.
# -----------------------------------------------------------------------------
def _mm_epilogue_kernel(*refs, apply_relu, has_residual):
    if has_residual:
        a_ref, w_ref, scale_ref, shift_ref, res_ref, o_ref, acc_ref = refs
    else:
        a_ref, w_ref, scale_ref, shift_ref, o_ref, acc_ref = refs
        res_ref = None

    @pl.when(pl.program_id(2) == 0)
    def _init():
        acc_ref[...] = jnp.zeros_like(acc_ref)

    acc_ref[...] += jnp.dot(a_ref[...], w_ref[...],
                            preferred_element_type=jnp.float32)

    @pl.when(pl.program_id(2) == pl.num_programs(2) - 1)
    def _finalize():
        y = acc_ref[...] * scale_ref[...] + shift_ref[...]
        if has_residual:
            y = y + res_ref[...].astype(jnp.float32)
        if apply_relu:
            y = jnp.maximum(y, 0.0)
        o_ref[...] = y.astype(o_ref.dtype)


def fused_matmul(a, w, scale, shift, residual=None, *,
                 apply_relu=True, out_dtype=ACT_DTYPE):
    """out = relu?((a @ w) * scale + shift [+ residual])."""
    M, K = a.shape
    K2, N = w.shape
    assert K == K2

    tm, Mp = _pick_tile(M, TM_CAP)
    tk, Kp = _pick_tile(K, TK_CAP)
    tn, Np = _pick_tile(N, TN_CAP)     # never narrower than 128; 256 preferred

    a_p = _pad2(a.astype(jnp.bfloat16), Mp - M, Kp - K)
    w_p = _pad2(w.astype(jnp.bfloat16), Kp - K, Np - N)
    scale_p = _pad2(scale.astype(jnp.float32).reshape(1, N), 0, Np - N)
    shift_p = _pad2(shift.astype(jnp.float32).reshape(1, N), 0, Np - N)

    inputs = [a_p, w_p, scale_p, shift_p]
    in_specs = [
        pl.BlockSpec((tm, tk), lambda i, j, k: (i, k)),
        pl.BlockSpec((tk, tn), lambda i, j, k: (k, j)),
        pl.BlockSpec((1, tn), lambda i, j, k: (0, j)),
        pl.BlockSpec((1, tn), lambda i, j, k: (0, j)),
    ]
    has_residual = residual is not None
    if has_residual:
        res_p = _pad2(residual.astype(jnp.bfloat16), Mp - M, Np - N)
        inputs.append(res_p)
        in_specs.append(pl.BlockSpec((tm, tn), lambda i, j, k: (i, j)))

    grid = (Mp // tm, Np // tn, Kp // tk)   # K (reduction) last
    out = pl.pallas_call(
        functools.partial(_mm_epilogue_kernel,
                          apply_relu=apply_relu, has_residual=has_residual),
        out_shape=jax.ShapeDtypeStruct((Mp, Np), out_dtype),
        grid_spec=pltpu.PrefetchScalarGridSpec(
            num_scalar_prefetch=0,
            grid=grid,
            in_specs=in_specs,
            out_specs=pl.BlockSpec((tm, tn), lambda i, j, k: (i, j)),
            scratch_shapes=[pltpu.VMEM((tm, tn), jnp.float32)],
        ),
        compiler_params=pltpu.CompilerParams(
            dimension_semantics=("parallel", "parallel", "arbitrary"),
            vmem_limit_bytes=VMEM_LIMIT),
    )(*inputs)
    return out[:M, :N]


# -----------------------------------------------------------------------------
# Pallas kernel 2: stride-1 KxK conv via shifted-window ("tap") matmuls.
# A = flattened spatially-padded NHWC input (rows, Cin).  For tap (di, dj) the
# operand is A shifted by di*Wq + dj rows, so one (tm + ext, Cin) window per M
# block feeds all k*k taps from VMEM.  No im2col is ever written to HBM.
# -----------------------------------------------------------------------------
def _conv_tap_kernel(*refs, offs, tm, tck, n_cblocks, apply_relu, has_residual):
    if has_residual:
        a_hbm, w_ref, scale_ref, shift_ref, res_ref, o_ref, a_scr, acc_ref, sem = refs
    else:
        a_hbm, w_ref, scale_ref, shift_ref, o_ref, a_scr, acc_ref, sem = refs
        res_ref = None

    i = pl.program_id(0)
    j = pl.program_id(1)
    cb = pl.program_id(2)

    # Load the input-row window for this M block once; every (j, cb) step and
    # all k*k taps reuse it from VMEM.
    @pl.when(jnp.logical_and(j == 0, cb == 0))
    def _load():
        cp = pltpu.make_async_copy(
            a_hbm.at[pl.ds(i * tm, a_scr.shape[0]), :], a_scr, sem.at[0])
        cp.start()
        cp.wait()

    col0 = pl.multiple_of(cb * tck, 128)
    partial = None
    for t, off in enumerate(offs):          # static unroll over the k*k taps
        a_t = a_scr[pl.ds(off, tm), pl.ds(col0, tck)]
        d = jnp.dot(a_t, w_ref[t], preferred_element_type=jnp.float32)
        partial = d if partial is None else partial + d

    def _epilogue(y):
        y = y * scale_ref[...] + shift_ref[...]
        if has_residual:
            y = y + res_ref[...].astype(jnp.float32)
        if apply_relu:
            y = jnp.maximum(y, 0.0)
        o_ref[...] = y.astype(o_ref.dtype)

    if n_cblocks == 1:
        _epilogue(partial)
    else:
        @pl.when(cb == 0)
        def _init():
            acc_ref[...] = jnp.zeros_like(acc_ref)

        acc_ref[...] += partial

        @pl.when(cb == n_cblocks - 1)
        def _fin():
            _epilogue(acc_ref[...])


def conv_tap_s1(x, w, bias, bn, residual, *, relu, out_dtype=ACT_DTYPE):
    """Stride-1, pad=k//2, odd-KxK conv + folded BN + residual + ReLU."""
    n, H, W, cin = x.shape
    cout, cin_w, kh, kw = w.shape
    assert kh == kw and kh % 2 == 1 and cin_w == cin
    k = kh
    p = k // 2
    Hq, Wq = H + 2 * p, W + 2 * p
    Mdom = n * Hq * Wq
    Cinp = _round_up(cin, 128)
    Np = _round_up(cout, 128)

    tm = min(TM_CAP, _round_up(Mdom, 128))
    Mp = _round_up(Mdom, tm)
    tn = _largest_div_mult128(Np, TN_CAP)
    tck = _largest_div_mult128(Cinp, TCK_CAP)
    n_cblocks = Cinp // tck

    off_max = (k - 1) * Wq + (k - 1)
    ext = _round_up(off_max, 8)
    win = tm + ext

    # Flattened padded input with trailing zero rows so every (tm + ext)
    # window stays in bounds.  (pad -> reshape -> pad is one fused XLA copy.)
    xq = jnp.pad(x.astype(ACT_DTYPE), ((0, 0), (p, p), (p, p), (0, 0)))
    a_flat = jnp.pad(xq.reshape(Mdom, cin),
                     ((0, Mp + ext - Mdom), (0, Cinp - cin)))

    # Weights as (k*k, Cin, Cout); tap order matches `offs`.
    wt = jnp.transpose(w, (2, 3, 1, 0)).reshape(k * k, cin, cout)
    wt = jnp.pad(wt.astype(jnp.bfloat16),
                 ((0, 0), (0, Cinp - cin), (0, Np - cout)))

    offs = tuple(di * Wq + dj for di in range(k) for dj in range(k))

    scale, shift = _fold_bn(bias, bn, cout)
    scale_p = jnp.pad(scale.astype(jnp.float32).reshape(1, cout),
                      ((0, 0), (0, Np - cout)))
    shift_p = jnp.pad(shift.astype(jnp.float32).reshape(1, cout),
                      ((0, 0), (0, Np - cout)))

    inputs = [a_flat, wt, scale_p, shift_p]
    in_specs = [
        pl.BlockSpec(memory_space=pl.ANY),                       # manual DMA
        pl.BlockSpec((k * k, tck, tn), lambda i, j, c: (0, c, j)),
        pl.BlockSpec((1, tn), lambda i, j, c: (0, j)),
        pl.BlockSpec((1, tn), lambda i, j, c: (0, j)),
    ]
    has_residual = residual is not None
    if has_residual:
        # Residual laid out on the padded-pixel domain (valid pixels sit at
        # the top-left HxW corner of the Hq x Wq canvas).
        res_p = jnp.pad(residual.astype(ACT_DTYPE),
                        ((0, 0), (0, 2 * p), (0, 2 * p), (0, Np - cout)))
        res_p = jnp.pad(res_p.reshape(Mdom, Np), ((0, Mp - Mdom), (0, 0)))
        inputs.append(res_p)
        in_specs.append(pl.BlockSpec((tm, tn), lambda i, j, c: (i, j)))

    grid = (Mp // tm, Np // tn, n_cblocks)
    out = pl.pallas_call(
        functools.partial(_conv_tap_kernel, offs=offs, tm=tm, tck=tck,
                          n_cblocks=n_cblocks, apply_relu=relu,
                          has_residual=has_residual),
        out_shape=jax.ShapeDtypeStruct((Mp, Np), out_dtype),
        grid_spec=pltpu.PrefetchScalarGridSpec(
            num_scalar_prefetch=0,
            grid=grid,
            in_specs=in_specs,
            out_specs=pl.BlockSpec((tm, tn), lambda i, j, c: (i, j)),
            scratch_shapes=[
                pltpu.VMEM((win, Cinp), jnp.bfloat16),     # input row window
                pltpu.VMEM((tm, tn), jnp.float32),         # f32 accumulator
                pltpu.SemaphoreType.DMA((1,)),
            ]),
        compiler_params=pltpu.CompilerParams(
            dimension_semantics=("parallel", "arbitrary", "arbitrary"),
            vmem_limit_bytes=VMEM_LIMIT),
    )(*inputs)
    out = out[:Mdom].reshape(n, Hq, Wq, Np)[:, :H, :W, :cout]
    return out


# -----------------------------------------------------------------------------
# Conv2d (+ folded BN + residual + ReLU) dispatch
# -----------------------------------------------------------------------------
def im2col_nhwc(x, kh, kw, stride, pad):
    n, h, w, c = x.shape
    xp = jnp.pad(x, ((0, 0), (pad, pad), (pad, pad), (0, 0)))
    hout = (h + 2 * pad - kh) // stride + 1
    wout = (w + 2 * pad - kw) // stride + 1
    cols = []
    for di in range(kh):
        for dj in range(kw):
            cols.append(xp[:, di:di + (hout - 1) * stride + 1:stride,
                              dj:dj + (wout - 1) * stride + 1:stride, :])
    p = jnp.stack(cols, axis=3)                       # (n, hout, wout, kh*kw, c)
    mat = p.reshape(n * hout * wout, kh * kw * c)     # feature order: (di,dj),c
    return mat, hout, wout


@functools.partial(jax.jit,
                   static_argnames=("stride", "pad", "relu", "out_dtype"))
def conv_bn_act(x, w, bias, bn, residual, *, stride, pad, relu,
                out_dtype=ACT_DTYPE):
    """x: NHWC.  w: (Cout, Cin, kh, kw) PyTorch layout.  residual: NHWC/None."""
    cout, cin, kh, kw = w.shape
    n = x.shape[0]

    if stride == 1 and kh == kw and kh > 1 and pad == kh // 2:
        # fused tap-conv kernel (no im2col materialisation)
        return conv_tap_s1(x, w, bias, bn, residual, relu=relu,
                           out_dtype=out_dtype)

    scale, shift = _fold_bn(bias, bn, cout)

    if stride == 1 and kh == 1 and kw == 1 and pad == 0:
        H, W = x.shape[1], x.shape[2]
        mat = x.reshape(n * H * W, cin)               # free reshape, no im2col
        wmat = w.reshape(cout, cin).T
        res_mat = (residual.reshape(n * H * W, cout)
                   if residual is not None else None)
        out = fused_matmul(mat, wmat, scale, shift, res_mat,
                           apply_relu=relu, out_dtype=out_dtype)
        return out.reshape(n, H, W, cout)

    # Strided convs (few, small) keep the im2col path.
    mat, hout, wout = im2col_nhwc(x, kh, kw, stride, pad)
    wmat = jnp.transpose(w, (2, 3, 1, 0)).reshape(kh * kw * cin, cout)
    res_mat = (residual.reshape(n * hout * wout, cout)
               if residual is not None else None)
    out = fused_matmul(mat, wmat, scale, shift, res_mat,
                       apply_relu=relu, out_dtype=out_dtype)
    return out.reshape(n, hout, wout, cout)


# -----------------------------------------------------------------------------
# Glue ops (NHWC pool / upsample)
# -----------------------------------------------------------------------------
def maxpool_3x3_s2_p1(x):
    return lax.reduce_window(
        x, jnp.array(-jnp.inf, x.dtype), lax.max,
        window_dimensions=(1, 3, 3, 1),
        window_strides=(1, 2, 2, 1),
        padding=((0, 0), (1, 1), (1, 1), (0, 0)))


def upsample_nearest(x, out_hw):
    n, h, w, c = x.shape
    ho, wo = out_hw
    hi = (jnp.arange(ho) * h) // ho
    wi = (jnp.arange(wo) * w) // wo
    return x[:, hi[:, None], wi[None, :], :]


def up2(x):
    return upsample_nearest(x, (x.shape[1] * 2, x.shape[2] * 2))


# -----------------------------------------------------------------------------
# Deterministic parameter construction (synthetic init, no checkpoint load)
# -----------------------------------------------------------------------------
class ParamGen:
    def __init__(self, seed):
        self.rng = np.random.RandomState(seed)

    def conv_w(self, cout, cin, kh, kw):
        fan_in = cin * kh * kw
        w = self.rng.randn(cout, cin, kh, kw).astype(np.float32) / np.sqrt(fan_in)
        return jnp.asarray(w)

    def bias(self, c):
        return jnp.asarray(0.01 * self.rng.randn(c).astype(np.float32))

    def bn(self, c):
        return {
            'gamma': jnp.asarray(1.0 + 0.1 * self.rng.randn(c).astype(np.float32)),
            'beta': jnp.asarray(0.1 * self.rng.randn(c).astype(np.float32)),
            'mean': jnp.asarray(0.1 * self.rng.randn(c).astype(np.float32)),
            'var': jnp.asarray(1.0 + 0.1 * np.abs(self.rng.randn(c)).astype(np.float32)),
        }


def make_basic_block(gen, cin, cout, stride):
    blk = {'conv1_w': gen.conv_w(cout, cin, 3, 3), 'bn1': gen.bn(cout),
           'conv2_w': gen.conv_w(cout, cout, 3, 3), 'bn2': gen.bn(cout)}
    if stride != 1 or cin != cout:
        blk['ds_w'] = gen.conv_w(cout, cin, 1, 1)
        blk['ds_bn'] = gen.bn(cout)
    return blk


def make_layer(gen, cin, cout, nblocks, stride):
    blocks, strides = [], []
    for b in range(nblocks):
        s = stride if b == 0 else 1
        inc = cin if b == 0 else cout
        blocks.append(make_basic_block(gen, inc, cout, s))
        strides.append(s)
    return blocks, strides


def make_dec_conv(gen, cin, cout, k=3):
    return {'w': gen.conv_w(cout, cin, k, k), 'b': gen.bias(cout),
            'bn': gen.bn(cout)}


def build_params(n_classes, seed=0, width_div=WIDTH_DIV):
    c = 64 // width_div        # base width (ResNet34 uses 64)
    gen = ParamGen(seed)
    P = {}
    # ResNet34 encoder (block counts 3,4,6,3)
    P['conv1_w'] = gen.conv_w(c, 3, 7, 7)
    P['bn1'] = gen.bn(c)
    P['layer1'], P['layer1_s'] = make_layer(gen, c, c, 3, 1)
    P['layer2'], P['layer2_s'] = make_layer(gen, c, 2 * c, 4, 2)
    P['layer3'], P['layer3_s'] = make_layer(gen, 2 * c, 4 * c, 6, 2)
    P['layer4'], P['layer4_s'] = make_layer(gen, 4 * c, 8 * c, 3, 2)
    # Extra encoder / decoder convs (conv + BN + dropout(id) + ReLU)
    P['conv2d_0'] = make_dec_conv(gen, 8 * c, 16 * c)
    P['conv2d_01'] = make_dec_conv(gen, 16 * c, 32 * c)
    P['conv2d_00d'] = make_dec_conv(gen, 32 * c + 32 * c, 32 * c)
    P['conv2d_01d'] = make_dec_conv(gen, 32 * c + 16 * c, 16 * c)
    P['conv2d_02d'] = make_dec_conv(gen, 16 * c + 8 * c, 8 * c)
    P['conv2d_1'] = make_dec_conv(gen, 8 * c + 4 * c, 4 * c)
    P['conv2d_2'] = make_dec_conv(gen, 4 * c + 2 * c, 2 * c)
    P['conv2d_3'] = make_dec_conv(gen, 2 * c + c, c)
    P['conv2d_4'] = make_dec_conv(gen, c + c, c)
    P['conv2d_f'] = {'w': gen.conv_w(n_classes, c, 1, 1),
                     'b': gen.bias(n_classes)}
    return P


# -----------------------------------------------------------------------------
# Forward pass (NHWC internally; NCHW at the host boundary)
# -----------------------------------------------------------------------------
def basic_block_fwd(x, blk, stride):
    h = conv_bn_act(x, blk['conv1_w'], None, blk['bn1'], None,
                    stride=stride, pad=1, relu=True)
    if 'ds_w' in blk:
        identity = conv_bn_act(x, blk['ds_w'], None, blk['ds_bn'], None,
                               stride=stride, pad=0, relu=False)
    else:
        identity = x
    # second conv: BN + residual add + ReLU fused into the epilogue
    return conv_bn_act(h, blk['conv2_w'], None, blk['bn2'], identity,
                       stride=1, pad=1, relu=True)


def dec_conv_fwd(x, p, stride=1, pad=1):
    # Conv2d -> BatchNorm2d -> Dropout2d(eval: identity) -> ReLU, all fused
    return conv_bn_act(x, p['w'], p['b'], p['bn'], None,
                       stride=stride, pad=pad, relu=True)


def unet_resnet34_forward(params, x_nchw):
    x = jnp.transpose(x_nchw, (0, 2, 3, 1))            # NHWC
    # seq1 = conv1 + bn1 + relu
    x1e = conv_bn_act(x, params['conv1_w'], None, params['bn1'], None,
                      stride=2, pad=3, relu=True)
    # seq2 = maxpool + layer1
    h = maxpool_3x3_s2_p1(x1e)
    for blk, s in zip(params['layer1'], params['layer1_s']):
        h = basic_block_fwd(h, blk, s)
    x2e = h
    for blk, s in zip(params['layer2'], params['layer2_s']):
        h = basic_block_fwd(h, blk, s)
    x3e = h
    for blk, s in zip(params['layer3'], params['layer3_s']):
        h = basic_block_fwd(h, blk, s)
    x4e = h
    for blk, s in zip(params['layer4'], params['layer4_s']):
        h = basic_block_fwd(h, blk, s)
    x5e = h

    x6e = dec_conv_fwd(x5e, params['conv2d_0'], stride=2, pad=1)
    x7e = dec_conv_fwd(x6e, params['conv2d_01'], stride=2, pad=1)
    x8e = jnp.mean(x7e.astype(jnp.float32), axis=(1, 2),
                   keepdims=True).astype(ACT_DTYPE)     # AdaptiveAvgPool2d((1,1))

    x7d = dec_conv_fwd(jnp.concatenate([x7e, up2(x8e)], axis=-1),
                       params['conv2d_00d'])
    x6d = dec_conv_fwd(jnp.concatenate([x6e, up2(x7d)], axis=-1),
                       params['conv2d_01d'])
    x5d = dec_conv_fwd(jnp.concatenate([x5e, upsample_nearest(x6d, (7, 7))],
                                       axis=-1), params['conv2d_02d'])
    x4d = dec_conv_fwd(jnp.concatenate([x4e, up2(x5d)], axis=-1),
                       params['conv2d_1'])
    x3d = dec_conv_fwd(jnp.concatenate([x3e, up2(x4d)], axis=-1),
                       params['conv2d_2'])
    x2d = dec_conv_fwd(jnp.concatenate([x2e, up2(x3d)], axis=-1),
                       params['conv2d_3'])
    x1d = dec_conv_fwd(jnp.concatenate([x1e, up2(x2d)], axis=-1),
                       params['conv2d_4'])
    final = conv_bn_act(up2(x1d), params['conv2d_f']['w'],
                        params['conv2d_f']['b'], None, None,
                        stride=1, pad=0, relu=False, out_dtype=jnp.float32)
    return jnp.transpose(final, (0, 3, 1, 2))            # back to NCHW


if __name__ == "__main__":
    n_classes = 5
    params = build_params(n_classes, seed=0)

    key = jax.random.PRNGKey(0)
    # The architecture (hard-coded upsample_7x7 at the bottleneck) forces a
    # 224x224 input; batch=1 and 1/8-width channels keep the demo small.
    x = jax.random.normal(key, (1, 3, 224, 224), dtype=jnp.float32)

    out = unet_resnet34_forward(params, x)
    out = jax.block_until_ready(out)

    assert out.shape == (1, n_classes, 224, 224), out.shape
    assert bool(jnp.all(jnp.isfinite(out)))
    print("KERNEL_OK")
</pallas_src>

<mosaic_0001>
module attributes {stable_mosaic.version = 11 : i64} {
  func.func @_mm_epilogue_kernel(%arg0: i32, %arg1: i32, %arg2: i32, %arg3: memref<896x256xbf16, #tpu.memory_space<vmem>>, %arg4: memref<256x128xbf16, #tpu.memory_space<vmem>>, %arg5: memref<1x128xf32, #tpu.memory_space<vmem>>, %arg6: memref<1x128xf32, #tpu.memory_space<vmem>>, %arg7: memref<896x128xbf16, #tpu.memory_space<vmem>>, %arg8: memref<896x128xf32, #tpu.memory_space<vmem>>) attributes {dimension_semantics = [#tpu.dimension_semantics<parallel>, #tpu.dimension_semantics<parallel>, #tpu.dimension_semantics<arbitrary>], iteration_bounds = array<i64: 14, 1, 1>, scalar_prefetch = 0 : i64, scratch_operands = 1 : i64, tpu.core_type = #tpu.core_type<tc>, window_params = [{transform_indices = @transform_0, window_bounds = array<i64: 896, 256>}, {transform_indices = @transform_1, window_bounds = array<i64: 256, 128>}, {transform_indices = @transform_2, window_bounds = array<i64: 1, 128>}, {transform_indices = @transform_3, window_bounds = array<i64: 1, 128>}, {transform_indices = @transform_4, window_bounds = array<i64: 896, 128>}]} {
    %c0_i32 = arith.constant 0 : i32
    %0 = arith.cmpi eq, %arg2, %c0_i32 : i32
    %1 = arith.extui %0 : i1 to i32
    %c0_i32_0 = arith.constant 0 : i32
    %2 = arith.cmpi ne, %1, %c0_i32_0 : i32
    scf.if %2 {
      %cst_10 = arith.constant 0.000000e+00 : f32
      %12 = vector.broadcast %cst_10 : f32 to vector<896x128xf32>
      %c0_11 = arith.constant 0 : index
      %c0_12 = arith.constant 0 : index
      %13 = vector.load %arg8[%c0_11, %c0_12] : memref<896x128xf32, #tpu.memory_space<vmem>>, vector<896x128xf32>
      tpu.vector_store %arg8[%c0_11, %c0_12], %12 {strides = array<i32>} : memref<896x128xf32, #tpu.memory_space<vmem>>, vector<896x128xf32>,
    } else {
    }
    %c0 = arith.constant 0 : index
    %c0_1 = arith.constant 0 : index
    %3 = vector.load %arg8[%c0, %c0_1] : memref<896x128xf32, #tpu.memory_space<vmem>>, vector<896x128xf32>
    %c0_2 = arith.constant 0 : index
    %c0_3 = arith.constant 0 : index
    %4 = vector.load %arg3[%c0_2, %c0_3] : memref<896x256xbf16, #tpu.memory_space<vmem>>, vector<896x256xbf16>
    %c0_4 = arith.constant 0 : index
    %c0_5 = arith.constant 0 : index
    %5 = vector.load %arg4[%c0_4, %c0_5] : memref<256x128xbf16, #tpu.memory_space<vmem>>, vector<256x128xbf16>
    %cst = arith.constant dense<0.000000e+00> : vector<896x128xf32>
    %6 = tpu.matmul %4, %5, %cst {dimension_numbers = #tpu.dot_dimension_numbers<[1], [0], [0], [1], [0, 0, 1, 1], [], []>} : vector<896x256xbf16>, vector<256x128xbf16>, vector<896x128xf32> -> vector<896x128xf32>
    %7 = arith.addf %3, %6 : vector<896x128xf32>
    %c0_6 = arith.constant 0 : index
    %c0_7 = arith.constant 0 : index
    %8 = vector.load %arg8[%c0_6, %c0_7] : memref<896x128xf32, #tpu.memory_space<vmem>>, vector<896x128xf32>
    tpu.vector_store %arg8[%c0_6, %c0_7], %7 {strides = array<i32>} : memref<896x128xf32, #tpu.memory_space<vmem>>, vector<896x128xf32>,
    %c0_i32_8 = arith.constant 0 : i32
    %9 = arith.cmpi eq, %arg2, %c0_i32_8 : i32
    %10 = arith.extui %9 : i1 to i32
    %c0_i32_9 = arith.constant 0 : i32
    %11 = arith.cmpi ne, %10, %c0_i32_9 : i32
    scf.if %11 {
      %c0_10 = arith.constant 0 : index
      %c0_11 = arith.constant 0 : index
      %12 = vector.load %arg8[%c0_10, %c0_11] : memref<896x128xf32, #tpu.memory_space<vmem>>, vector<896x128xf32>
      %c0_12 = arith.constant 0 : index
      %c0_13 = arith.constant 0 : index
      %13 = vector.load %arg5[%c0_12, %c0_13] : memref<1x128xf32, #tpu.memory_space<vmem>>, vector<1x128xf32>
      %14 = vector.broadcast %13 : vector<1x128xf32> to vector<896x128xf32>
      %15 = arith.mulf %12, %14 : vector<896x128xf32>
      %c0_14 = arith.constant 0 : index
      %c0_15 = arith.constant 0 : index
      %16 = vector.load %arg6[%c0_14, %c0_15] : memref<1x128xf32, #tpu.memory_space<vmem>>, vector<1x128xf32>
      %17 = vector.broadcast %16 : vector<1x128xf32> to vector<896x128xf32>
      %18 = arith.addf %15, %17 : vector<896x128xf32>
      %cst_16 = arith.constant 0.000000e+00 : f32
      %19 = vector.broadcast %cst_16 : f32 to vector<896x128xf32>
      %20 = arith.maximumf %18, %19 : vector<896x128xf32>
      %21 = arith.truncf %20 : vector<896x128xf32> to vector<896x128xbf16>
      %c0_17 = arith.constant 0 : index
      %c0_18 = arith.constant 0 : index
      %22 = vector.load %arg7[%c0_17, %c0_18] : memref<896x128xbf16, #tpu.memory_space<vmem>>, vector<896x128xbf16>
      tpu.vector_store %arg7[%c0_17, %c0_18], %21 {strides = array<i32>} : memref<896x128xbf16, #tpu.memory_space<vmem>>, vector<896x128xbf16>,
    } else {
    }
    return
  }
  func.func @transform_0(%arg0: i32, %arg1: i32, %arg2: i32) -> (i32, i32) {
    %c0_i32 = arith.constant 0 : i32
    return %arg0, %arg2 : i32, i32
  }
  func.func @transform_1(%arg0: i32, %arg1: i32, %arg2: i32) -> (i32, i32) {
    %c0_i32 = arith.constant 0 : i32
    return %arg2, %arg1 : i32, i32
  }
  func.func @transform_2(%arg0: i32, %arg1: i32, %arg2: i32) -> (i32, i32) {
    %c0_i32 = arith.constant 0 : i32
    %c0_i32_0 = arith.constant 0 : i32
    return %c0_i32, %arg1 : i32, i32
  }
  func.func @transform_3(%arg0: i32, %arg1: i32, %arg2: i32) -> (i32, i32) {
    %c0_i32 = arith.constant 0 : i32
    %c0_i32_0 = arith.constant 0 : i32
    return %c0_i32, %arg1 : i32, i32
  }
  func.func @transform_4(%arg0: i32, %arg1: i32, %arg2: i32) -> (i32, i32) {
    %c0_i32 = arith.constant 0 : i32
    return %arg0, %arg1 : i32, i32
  }
}

</mosaic_0001>

<bundles_post_ra>
// kernel: conv_bn_act.1
= control target key start
LH: loop header
LB: loop body
LE: loop exit
PB: predicated region body
PF: predicated region fallthrough
CT: control target
= control target key end

     0   :  { %s4189_s15 = smov 0   ;;  %s4191_s16 = smov 0   ;;  %s4722_s0 = inlined_call_operand.vmem [shape: bf16[12544,256], index: 0, kind: input, shape index: {}]   ;;  %s4723_s1 = inlined_call_operand.vmem [shape: bf16[256,128], index: 1, kind: input, shape index: {}]   ;;  %s4724_s2 = inlined_call_operand.vmem [shape: f32[1,128], index: 2, kind: input, shape index: {}]   ;;  %s4725_s3 = inlined_call_operand.vmem [shape: f32[1,128], index: 3, kind: input, shape index: {}]   ;;  %s4726_s4 = inlined_call_operand.vmem [shape: bf16[12544,128], index: 4, kind: output, shape index: {}]  }
   0x1   :  { %s4193_s17 = smov 0  }
   0x2 LB: > { %s33_s18 = sadd.s32 1, %s4157_s16  ;;  %p3200_p0 = scmp.ge.s32.totalorder %s4161_s17, 1  ;;  %s4161_s17 = sphi %s4193_s17, %s14_s17   ;;  %s4157_s16 = sphi %s4191_s16, %s4728_s16   ;;  %s4153_s15 = sphi %s4189_s15, %s4727_s15  }
   0x3   : > { %p35_p1 = scmp.ge.s32.totalorder %s33_s18, 14  ;;  %p224_p2 = scmp.lt.s32.totalorder %s4161_s17, 15 }
   0x5   : > { %s4730_s18 = smov (%p35_p1, %s33_s18), 0  ;;  %p225_p3 = pnand %p3200_p0, %p224_p2 }
   0x6   : > { %s272_s21 = smul.u32 (!%p225_p3), 112, %s4153_s15 }
   0x7   : > { %228 = sbr.rel (%p225_p3) target bundleno = 499 (0x1f3), region = 36 }
   0x8   : > { %p274_p4 = scmp.lt.s32.totalorder (!%p225_p3), %s272_s21, 1567 }
   0xc   : > { %v3953_v0 = vld [vmem:[%s4723_s1 + $0x38] sm:$0xff]   ;;  %v4163_v1 = vmov 0   ;;  %v3954_v2 = vld [vmem:[%s4723_s1 + $0x30] sm:$0xff]   ;;  %v3955_v3 = vld [vmem:[%s4723_s1 + $0x28] sm:$0xff]   ;;  %s4732_s21 = smov (!%p274_p4, %s272_s21), 1567 }
   0xd   : > { %1337 = vmatprep.subr.bf16.mxu0 %v4163_v1  ;;  %3896 = vmatprep.subr.bf16.mxu1 %v4163_v1  ;;  %v3956_v4 = vld [vmem:[%s4723_s1 + $0x20] sm:$0xff]   ;;  %s3448_s28 = sshll.u32 %s4732_s21, 3  ;;  %v3957_v5 = vld [vmem:[%s4723_s1 + $0x18] sm:$0xff]   ;;  %v3958_v7 = vld [vmem:[%s4723_s1 + $0x10] sm:$0xff]   ;;  %s3203_s13 = sshll.u32 %s4732_s21, 2 }
   0xe   : > { %1338 = vmatpush1.bf16.msra.mxu0 %v3953_v0  ;;  %3912 = vmatpush1.bf16.msra.mxu1 %v3953_v0  ;;  %s4236_s7 = scalar_lea.vmem %s4722_s0, %s3448_s28  ;;  %v3959_v9 = vld [vmem:[%s4723_s1 + $0x8] sm:$0xff]   ;;  %v3960_v10 = vld [vmem:[%s4723_s1] sm:$0xff]   ;;  %v3961_v11 = vld [vmem:[%s4723_s1 + $0x78] sm:$0xff]   ;;  %s4425_s15 = scalar_lea.vmem %s4726_s4, %s3203_s13 }
   0xf   : > { %1339 = vmatprep.subr.bf16.mxu0 %v4163_v1  ;;  %3897 = vmatprep.subr.bf16.mxu1 %v4163_v1  ;;  %v3971_v6 = vld [vmem:[%s4236_s7 + $0x4] ss:$8 sps:$4 sm:$0xff]   ;;  %v3962_v12 = vld [vmem:[%s4723_s1 + $0x70] sm:$0xff]   ;;  %v3965_v15 = vld [vmem:[%s4723_s1 + $0x58] sm:$0xff]  }
  0x10   : > { %v3974_v8 = vld [vmem:[%s4236_s7 + $0x1c4] ss:$8 sps:$4 sm:$0xff]   ;;  %1369 = vmatprep.mubr.bf16.mxu0 %v3971_v6  ;;  %v3966_v16 = vld [vmem:[%s4723_s1 + $0x50] sm:$0xff]   ;;  %v3969_v19 = vld [vmem:[%s4236_s7] ss:$8 sps:$4 sm:$0xff]  }
  0x11   : > { %1593 = vmatprep.mubr.bf16.mxu1 %v3974_v8  ;;  %v3963_v13 = vld [vmem:[%s4723_s1 + $0x68] sm:$0xff]   ;;  %v3964_v14 = vld [vmem:[%s4723_s1 + $0x60] sm:$0xff]   ;;  %v3975_v21 = vld [vmem:[%s4236_s7 + $0x14] ss:$8 sps:$4 sm:$0xff]  }
  0x12   : > { %1340 = vmatpush1.bf16.msra.mxu0 %v3954_v2  ;;  %3913 = vmatpush1.bf16.msra.mxu1 %v3954_v2  ;;  %v3967_v17 = vld [vmem:[%s4723_s1 + $0x48] sm:$0xff]   ;;  %v3968_v18 = vld [vmem:[%s4723_s1 + $0x40] sm:$0xff]   ;;  %v3977_v22 = vld [vmem:[%s4236_s7 + $0x1d4] ss:$8 sps:$4 sm:$0xff]  }
  0x13   : > { %1341 = vmatprep.subr.bf16.mxu0 %v4163_v1  ;;  %3898 = vmatprep.subr.bf16.mxu1 %v4163_v1  ;;  %v3972_v20 = vld [vmem:[%s4236_s7 + $0x1c0] ss:$8 sps:$4 sm:$0xff]   ;;  %v3979_v23 = vld [vmem:[%s4236_s7 + $0x10] ss:$8 sps:$4 sm:$0xff]   ;;  %v3981_v25 = vld [vmem:[%s4236_s7 + $0x24] ss:$8 sps:$4 sm:$0xff]  }
  0x14   : > { %v3980_v24 = vld [vmem:[%s4236_s7 + $0x1d0] ss:$8 sps:$4 sm:$0xff]   ;;  %v3983_v26 = vld [vmem:[%s4236_s7 + $0x1e4] ss:$8 sps:$4 sm:$0xff]   ;;  %v3985_v27 = vld [vmem:[%s4236_s7 + $0x20] ss:$8 sps:$4 sm:$0xff]  }
  0x15   : > { %v3986_v28 = vld [vmem:[%s4236_s7 + $0x1e0] ss:$8 sps:$4 sm:$0xff]   ;;  %v3987_v29 = vld [vmem:[%s4236_s7 + $0x34] ss:$8 sps:$4 sm:$0xff]   ;;  %v3991_v31 = vld [vmem:[%s4236_s7 + $0x30] ss:$8 sps:$4 sm:$0xff]  }
  0x16   : > { %1342 = vmatpush1.bf16.msra.mxu0 %v3955_v3  ;;  %3914 = vmatpush1.bf16.msra.mxu1 %v3955_v3  ;;  %v3989_v30 = vld [vmem:[%s4236_s7 + $0x1f4] ss:$8 sps:$4 sm:$0xff]   ;;  %v3992_v32 = vld [vmem:[%s4236_s7 + $0x1f0] ss:$8 sps:$4 sm:$0xff]   ;;  %v3993_v33 = vld [vmem:[%s4236_s7 + $0x44] ss:$8 sps:$4 sm:$0xff]  }
  0x17   : > { %1343 = vmatprep.subr.bf16.mxu0 %v4163_v1  ;;  %3899 = vmatprep.subr.bf16.mxu1 %v4163_v1  ;;  %v3995_v34 = vld [vmem:[%s4236_s7 + $0x204] ss:$8 sps:$4 sm:$0xff]   ;;  %v3997_v35 = vld [vmem:[%s4236_s7 + $0x40] ss:$8 sps:$4 sm:$0xff]   ;;  %v3999_v37 = vld [vmem:[%s4236_s7 + $0x54] ss:$8 sps:$4 sm:$0xff]  }
  0x18   : > { %v3998_v36 = vld [vmem:[%s4236_s7 + $0x200] ss:$8 sps:$4 sm:$0xff]   ;;  %v4001_v38 = vld [vmem:[%s4236_s7 + $0x214] ss:$8 sps:$4 sm:$0xff]   ;;  %v4003_v39 = vld [vmem:[%s4236_s7 + $0x50] ss:$8 sps:$4 sm:$0xff]  }
  0x19   : > { %v4004_v40 = vld [vmem:[%s4236_s7 + $0x210] ss:$8 sps:$4 sm:$0xff]   ;;  %v4005_v41 = vld [vmem:[%s4236_s7 + $0x64] ss:$8 sps:$4 sm:$0xff]   ;;  %v4009_v43 = vld [vmem:[%s4236_s7 + $0x60] ss:$8 sps:$4 sm:$0xff]  }
  0x1a   : > { %1344 = vmatpush1.bf16.msra.mxu0 %v3956_v4  ;;  %3915 = vmatpush1.bf16.msra.mxu1 %v3956_v4  ;;  %v4007_v42 = vld [vmem:[%s4236_s7 + $0x224] ss:$8 sps:$4 sm:$0xff]   ;;  %v4010_v44 = vld [vmem:[%s4236_s7 + $0x220] ss:$8 sps:$4 sm:$0xff]   ;;  %v4011_v45 = vld [vmem:[%s4236_s7 + $0x74] ss:$8 sps:$4 sm:$0xff]  }
  0x1b   : > { %1345 = vmatprep.subr.bf16.mxu0 %v4163_v1  ;;  %3900 = vmatprep.subr.bf16.mxu1 %v4163_v1  ;;  %v4013_v46 = vld [vmem:[%s4236_s7 + $0x234] ss:$8 sps:$4 sm:$0xff]   ;;  %v4015_v47 = vld [vmem:[%s4236_s7 + $0x70] ss:$8 sps:$4 sm:$0xff]   ;;  %v4017_v49 = vld [vmem:[%s4236_s7 + $0x84] ss:$8 sps:$4 sm:$0xff]  }
  0x1c   : > { %v4016_v48 = vld [vmem:[%s4236_s7 + $0x230] ss:$8 sps:$4 sm:$0xff]   ;;  %v4019_v50 = vld [vmem:[%s4236_s7 + $0x244] ss:$8 sps:$4 sm:$0xff]   ;;  %v4021_v51 = vld [vmem:[%s4236_s7 + $0x80] ss:$8 sps:$4 sm:$0xff]  }
  0x1d   : > { %v4022_v52 = vld [vmem:[%s4236_s7 + $0x240] ss:$8 sps:$4 sm:$0xff]   ;;  %v4023_v53 = vld [vmem:[%s4236_s7 + $0x94] ss:$8 sps:$4 sm:$0xff]   ;;  %v4027_v55 = vld [vmem:[%s4236_s7 + $0x90] ss:$8 sps:$4 sm:$0xff]  }
  0x1e   : > { %1346 = vmatpush1.bf16.msra.mxu0 %v3957_v5  ;;  %3916 = vmatpush1.bf16.msra.mxu1 %v3957_v5  ;;  %v4025_v54 = vld [vmem:[%s4236_s7 + $0x254] ss:$8 sps:$4 sm:$0xff]   ;;  %v4028_v56 = vld [vmem:[%s4236_s7 + $0x250] ss:$8 sps:$4 sm:$0xff]   ;;  %v4029_v57 = vld [vmem:[%s4236_s7 + $0xa4] ss:$8 sps:$4 sm:$0xff]  }
  0x1f   : > { %1347 = vmatprep.subr.bf16.mxu0 %v4163_v1  ;;  %3901 = vmatprep.subr.bf16.mxu1 %v4163_v1  ;;  %v4031_v58 = vld [vmem:[%s4236_s7 + $0x264] ss:$8 sps:$4 sm:$0xff]   ;;  %v4033_v59 = vld [vmem:[%s4236_s7 + $0xa0] ss:$8 sps:$4 sm:$0xff]   ;;  %v4035_v61 = vld [vmem:[%s4236_s7 + $0xb4] ss:$8 sps:$4 sm:$0xff]  }
  0x20   : > { %v4034_v60 = vld [vmem:[%s4236_s7 + $0x260] ss:$8 sps:$4 sm:$0xff]   ;;  %v4037_v62 = vld [vmem:[%s4236_s7 + $0x274] ss:$8 sps:$4 sm:$0xff]   ;;  %v4039_v63 = vld [vmem:[%s4236_s7 + $0xb0] ss:$8 sps:$4 sm:$0xff]  }
  0x21   : > { %v4040_v0 = vld [vmem:[%s4236_s7 + $0x270] ss:$8 sps:$4 sm:$0xff]   ;;  %v4043_v2 = vld [vmem:[%s4236_s7 + $0x284] ss:$8 sps:$4 sm:$0xff]   ;;  %v4045_v3 = vld [vmem:[%s4236_s7 + $0xc0] ss:$8 sps:$4 sm:$0xff]  }
  0x22   : > { %1348 = vmatpush1.bf16.msra.mxu0 %v3958_v7  ;;  %3917 = vmatpush1.bf16.msra.mxu1 %v3958_v7  ;;  %v4046_v4 = vld [vmem:[%s4236_s7 + $0x280] ss:$8 sps:$4 sm:$0xff]   ;;  %v4047_v5 = vld [vmem:[%s4236_s7 + $0xd4] ss:$8 sps:$4 sm:$0xff]   ;;  %v4051_v7 = vld [vmem:[%s4236_s7 + $0xd0] ss:$8 sps:$4 sm:$0xff]  }
  0x23   : > { %1349 = vmatprep.subr.bf16.mxu0 %v4163_v1  ;;  %3902 = vmatprep.subr.bf16.mxu1 %v4163_v1  ;;  %v4049_v6 = vld [vmem:[%s4236_s7 + $0x294] ss:$8 sps:$4 sm:$0xff]   ;;  %v4052_v8 = vld [vmem:[%s4236_s7 + $0x290] ss:$8 sps:$4 sm:$0xff]  }
  0x26   : > { %1350 = vmatpush1.bf16.msra.mxu0 %v3959_v9  ;;  %3918 = vmatpush1.bf16.msra.mxu1 %v3959_v9  ;;  %v4053_v9 = vld [vmem:[%s4236_s7 + $0xe4] ss:$8 sps:$4 sm:$0xff]  }
  0x27   : > { %1351 = vmatprep.subr.bf16.mxu0 %v4163_v1  ;;  %3903 = vmatprep.subr.bf16.mxu1 %v4163_v1 }
  0x2a   : > { %1352 = vmatpush1.bf16.msra.mxu0 %v3960_v10  ;;  %3919 = vmatpush1.bf16.msra.mxu1 %v3960_v10  ;;  %v4055_v10 = vld [vmem:[%s4236_s7 + $0x2a4] ss:$8 sps:$4 sm:$0xff]  }
  0x2b   : > { %1353 = vmatprep.subr.bf16.mxu0 %v4163_v1  ;;  %3904 = vmatprep.subr.bf16.mxu1 %v4163_v1 }
  0x2e   : > { %1354 = vmatpush2.bf16.msra.mxu0 %v3961_v11  ;;  %3920 = vmatpush2.bf16.msra.mxu1 %v3961_v11  ;;  %v4057_v11 = vld [vmem:[%s4236_s7 + $0xe0] ss:$8 sps:$4 sm:$0xff]  }
  0x2f   : > { %1355 = vmatprep.subr.bf16.mxu0 %v4163_v1  ;;  %3905 = vmatprep.subr.bf16.mxu1 %v4163_v1 }
  0x32   : > { %1356 = vmatpush2.bf16.msra.mxu0 %v3962_v12  ;;  %3921 = vmatpush2.bf16.msra.mxu1 %v3962_v12  ;;  %v4058_v12 = vld [vmem:[%s4236_s7 + $0x2a0] ss:$8 sps:$4 sm:$0xff]  }
  0x33   : > { %1357 = vmatprep.subr.bf16.mxu0 %v4163_v1  ;;  %3906 = vmatprep.subr.bf16.mxu1 %v4163_v1 }
  0x36   : > { %1358 = vmatpush2.bf16.msra.mxu0 %v3963_v13  ;;  %3922 = vmatpush2.bf16.msra.mxu1 %v3963_v13  ;;  %v4059_v13 = vld [vmem:[%s4236_s7 + $0xf4] ss:$8 sps:$4 sm:$0xff]  }
  0x37   : > { %1359 = vmatprep.subr.bf16.mxu0 %v4163_v1  ;;  %3907 = vmatprep.subr.bf16.mxu1 %v4163_v1 }
  0x3a   : > { %1360 = vmatpush2.bf16.msra.mxu0 %v3964_v14  ;;  %3923 = vmatpush2.bf16.msra.mxu1 %v3964_v14  ;;  %v4061_v14 = vld [vmem:[%s4236_s7 + $0x2b4] ss:$8 sps:$4 sm:$0xff]  }
  0x3b   : > { %1361 = vmatprep.subr.bf16.mxu0 %v4163_v1  ;;  %3908 = vmatprep.subr.bf16.mxu1 %v4163_v1 }
  0x3e   : > { %1362 = vmatpush2.bf16.msra.mxu0 %v3965_v15  ;;  %3924 = vmatpush2.bf16.msra.mxu1 %v3965_v15  ;;  %v4063_v15 = vld [vmem:[%s4236_s7 + $0xf0] ss:$8 sps:$4 sm:$0xff]  }
  0x3f   : > { %1363 = vmatprep.subr.bf16.mxu0 %v4163_v1  ;;  %3909 = vmatprep.subr.bf16.mxu1 %v4163_v1 }
  0x42   : > { %1364 = vmatpush2.bf16.msra.mxu0 %v3966_v16  ;;  %3925 = vmatpush2.bf16.msra.mxu1 %v3966_v16  ;;  %v4064_v16 = vld [vmem:[%s4236_s7 + $0x2b0] ss:$8 sps:$4 sm:$0xff]  }
  0x43   : > { %1365 = vmatprep.subr.bf16.mxu0 %v4163_v1  ;;  %3910 = vmatprep.subr.bf16.mxu1 %v4163_v1 }
  0x46   : > { %1366 = vmatpush2.bf16.msra.mxu0 %v3967_v17  ;;  %3926 = vmatpush2.bf16.msra.mxu1 %v3967_v17  ;;  %v4065_v17 = vld [vmem:[%s4236_s7 + $0x104] ss:$8 sps:$4 sm:$0xff]  }
  0x47   : > { %1367 = vmatprep.subr.bf16.mxu0 %v4163_v1  ;;  %3911 = vmatprep.subr.bf16.mxu1 %v4163_v1  ;;  %v4041_v1 = vld [vmem:[%s4236_s7 + $0xc4] ss:$8 sps:$4 sm:$0xff]  }
  0x4a   : > { %1368 = vmatpush2.bf16.msra.mxu0 %v3968_v18  ;;  %3927 = vmatpush2.bf16.msra.mxu1 %v3968_v18  ;;  %v4067_v18 = vld [vmem:[%s4236_s7 + $0x2c4] ss:$8 sps:$4 sm:$0xff]  }
  0x4d   : > { %1370 = vmatmul.mubr.bf16.vlgmr.msra.gmra.mxu0 %v3969_v19  ;;  %1594 = vmatmul.mubr.bf16.vlgmr.msra.gmra.mxu1 %v3972_v20  ;;  %v4069_v19 = vld [vmem:[%s4236_s7 + $0x100] ss:$8 sps:$4 sm:$0xff]  }
  0x4e   : > { %1377 = vmatprep.mubr.bf16.mxu0 %v3975_v21  ;;  %1601 = vmatprep.mubr.bf16.mxu1 %v3977_v22  ;;  %v4070_v20 = vld [vmem:[%s4236_s7 + $0x2c0] ss:$8 sps:$4 sm:$0xff]   ;;  %v4071_v21 = vld [vmem:[%s4236_s7 + $0x114] ss:$8 sps:$4 sm:$0xff]  }
  0x4f   : > { %v4073_v22 = vld [vmem:[%s4236_s7 + $0x2d4] ss:$8 sps:$4 sm:$0xff]  }
  0x55   : > { %1378 = vmatmul.mubr.bf16.gmra.mxu0 %v3979_v23  ;;  %1602 = vmatmul.mubr.bf16.gmra.mxu1 %v3980_v24  ;;  %v4075_v23 = vld [vmem:[%s4236_s7 + $0x110] ss:$8 sps:$4 sm:$0xff]  }
  0x56   : > { %1385 = vmatprep.mubr.bf16.mxu0 %v3981_v25  ;;  %1609 = vmatprep.mubr.bf16.mxu1 %v3983_v26  ;;  %v4076_v24 = vld [vmem:[%s4236_s7 + $0x2d0] ss:$8 sps:$4 sm:$0xff]   ;;  %v4077_v25 = vld [vmem:[%s4236_s7 + $0x124] ss:$8 sps:$4 sm:$0xff]  }
  0x57   : > { %v4079_v26 = vld [vmem:[%s4236_s7 + $0x2e4] ss:$8 sps:$4 sm:$0xff]  }
  0x5d   : > { %1386 = vmatmul.mubr.bf16.gmra.mxu0 %v3985_v27  ;;  %1610 = vmatmul.mubr.bf16.gmra.mxu1 %v3986_v28  ;;  %v4081_v27 = vld [vmem:[%s4236_s7 + $0x120] ss:$8 sps:$4 sm:$0xff]  }
  0x5e   : > { %1393 = vmatprep.mubr.bf16.mxu0 %v3987_v29  ;;  %1617 = vmatprep.mubr.bf16.mxu1 %v3989_v30  ;;  %v4082_v28 = vld [vmem:[%s4236_s7 + $0x2e0] ss:$8 sps:$4 sm:$0xff]   ;;  %v4083_v29 = vld [vmem:[%s4236_s7 + $0x134] ss:$8 sps:$4 sm:$0xff]  }
  0x5f   : > { %v4085_v30 = vld [vmem:[%s4236_s7 + $0x2f4] ss:$8 sps:$4 sm:$0xff]  }
  0x65   : > { %1394 = vmatmul.mubr.bf16.gmra.mxu0 %v3991_v31  ;;  %1618 = vmatmul.mubr.bf16.gmra.mxu1 %v3992_v32  ;;  %v4087_v31 = vld [vmem:[%s4236_s7 + $0x130] ss:$8 sps:$4 sm:$0xff]  }
  0x66   : > { %1401 = vmatprep.mubr.bf16.mxu0 %v3993_v33  ;;  %1625 = vmatprep.mubr.bf16.mxu1 %v3995_v34  ;;  %v4088_v32 = vld [vmem:[%s4236_s7 + $0x2f0] ss:$8 sps:$4 sm:$0xff]   ;;  %v4089_v33 = vld [vmem:[%s4236_s7 + $0x144] ss:$8 sps:$4 sm:$0xff]  }
  0x67   : > { %v4091_v34 = vld [vmem:[%s4236_s7 + $0x304] ss:$8 sps:$4 sm:$0xff]  }
  0x6d   : > { %1402 = vmatmul.mubr.bf16.gmra.mxu0 %v3997_v35  ;;  %1626 = vmatmul.mubr.bf16.gmra.mxu1 %v3998_v36  ;;  %v4093_v35 = vld [vmem:[%s4236_s7 + $0x140] ss:$8 sps:$4 sm:$0xff]  }
  0x6e   : > { %1409 = vmatprep.mubr.bf16.mxu0 %v3999_v37  ;;  %1633 = vmatprep.mubr.bf16.mxu1 %v4001_v38  ;;  %v4094_v36 = vld [vmem:[%s4236_s7 + $0x300] ss:$8 sps:$4 sm:$0xff]   ;;  %v4095_v37 = vld [vmem:[%s4236_s7 + $0x154] ss:$8 sps:$4 sm:$0xff]  }
  0x6f   : > { %v4097_v38 = vld [vmem:[%s4236_s7 + $0x314] ss:$8 sps:$4 sm:$0xff]  }
  0x75   : > { %1410 = vmatmul.mubr.bf16.gmra.mxu0 %v4003_v39  ;;  %1634 = vmatmul.mubr.bf16.gmra.mxu1 %v4004_v40  ;;  %v4099_v39 = vld [vmem:[%s4236_s7 + $0x150] ss:$8 sps:$4 sm:$0xff]  }
  0x76   : > { %1417 = vmatprep.mubr.bf16.mxu0 %v4005_v41  ;;  %1641 = vmatprep.mubr.bf16.mxu1 %v4007_v42  ;;  %v4100_v40 = vld [vmem:[%s4236_s7 + $0x310] ss:$8 sps:$4 sm:$0xff]   ;;  %v4101_v41 = vld [vmem:[%s4236_s7 + $0x164] ss:$8 sps:$4 sm:$0xff]  }
  0x77   : > { %v4103_v42 = vld [vmem:[%s4236_s7 + $0x324] ss:$8 sps:$4 sm:$0xff]  }
  0x7d   : > { %1418 = vmatmul.mubr.bf16.gmra.mxu0 %v4009_v43  ;;  %1642 = vmatmul.mubr.bf16.gmra.mxu1 %v4010_v44  ;;  %v4105_v43 = vld [vmem:[%s4236_s7 + $0x160] ss:$8 sps:$4 sm:$0xff]  }
  0x7e   : > { %1425 = vmatprep.mubr.bf16.mxu0 %v4011_v45  ;;  %1649 = vmatprep.mubr.bf16.mxu1 %v4013_v46  ;;  %v4106_v44 = vld [vmem:[%s4236_s7 + $0x320] ss:$8 sps:$4 sm:$0xff]   ;;  %v4107_v45 = vld [vmem:[%s4236_s7 + $0x174] ss:$8 sps:$4 sm:$0xff]  }
  0x7f   : > { %v4109_v46 = vld [vmem:[%s4236_s7 + $0x334] ss:$8 sps:$4 sm:$0xff]  }
  0x85   : > { %1426 = vmatmul.mubr.bf16.gmra.mxu0 %v4015_v47  ;;  %1650 = vmatmul.mubr.bf16.gmra.mxu1 %v4016_v48  ;;  %v4111_v47 = vld [vmem:[%s4236_s7 + $0x170] ss:$8 sps:$4 sm:$0xff]  }
  0x86   : > { %1433 = vmatprep.mubr.bf16.mxu0 %v4017_v49  ;;  %1657 = vmatprep.mubr.bf16.mxu1 %v4019_v50  ;;  %v4112_v48 = vld [vmem:[%s4236_s7 + $0x330] ss:$8 sps:$4 sm:$0xff]   ;;  %v4113_v49 = vld [vmem:[%s4236_s7 + $0x184] ss:$8 sps:$4 sm:$0xff]  }
  0x87   : > { %v4115_v50 = vld [vmem:[%s4236_s7 + $0x344] ss:$8 sps:$4 sm:$0xff]  }
  0x8d   : > { %1434 = vmatmul.mubr.bf16.gmra.mxu0 %v4021_v51  ;;  %1658 = vmatmul.mubr.bf16.gmra.mxu1 %v4022_v52  ;;  %v4117_v51 = vld [vmem:[%s4236_s7 + $0x180] ss:$8 sps:$4 sm:$0xff]  }
  0x8e   : > { %1441 = vmatprep.mubr.bf16.mxu0 %v4023_v53  ;;  %1665 = vmatprep.mubr.bf16.mxu1 %v4025_v54  ;;  %v4118_v52 = vld [vmem:[%s4236_s7 + $0x340] ss:$8 sps:$4 sm:$0xff]   ;;  %v4119_v53 = vld [vmem:[%s4236_s7 + $0x194] ss:$8 sps:$4 sm:$0xff]  }
  0x8f   : > { %v4121_v54 = vld [vmem:[%s4236_s7 + $0x354] ss:$8 sps:$4 sm:$0xff]  }
  0x95   : > { %1442 = vmatmul.mubr.bf16.gmra.mxu0 %v4027_v55  ;;  %1666 = vmatmul.mubr.bf16.gmra.mxu1 %v4028_v56  ;;  %v4400_v55 = vld [vmem:[%s4724_s2] ss:$0 sm:$0xff] }
  0x96   : > { %1449 = vmatprep.mubr.bf16.mxu0 %v4029_v57  ;;  %1673 = vmatprep.mubr.bf16.mxu1 %v4031_v58 }
  0x9d   : > { %1450 = vmatmul.mubr.bf16.gmra.mxu0 %v4033_v59  ;;  %1674 = vmatmul.mubr.bf16.gmra.mxu1 %v4034_v60  ;;  %v4406_v59 = vld [vmem:[%s4725_s3] ss:$0 sm:$0xff] }
  0x9e   : > { %1457 = vmatprep.mubr.bf16.mxu0 %v4035_v61  ;;  %1681 = vmatprep.mubr.bf16.mxu1 %v4037_v62 }
  0xa5   : > { %1458 = vmatmul.mubr.bf16.gmra.mxu0 %v4039_v63  ;;  %1682 = vmatmul.mubr.bf16.gmra.mxu1 %v4040_v0 }
  0xa6   : > { %1465 = vmatprep.mubr.bf16.mxu0 %v4041_v1  ;;  %1689 = vmatprep.mubr.bf16.mxu1 %v4043_v2 }
  0xad   : > { %1466 = vmatmul.mubr.bf16.gmra.mxu0 %v4045_v3  ;;  %1690 = vmatmul.mubr.bf16.gmra.mxu1 %v4046_v4  ;;  %v4123_v3 = vld [vmem:[%s4236_s7 + $0x190] ss:$8 sps:$4 sm:$0xff]  }
  0xae   : > { %1473 = vmatprep.mubr.bf16.mxu0 %v4047_v5  ;;  %1697 = vmatprep.mubr.bf16.mxu1 %v4049_v6  ;;  %v4124_v4 = vld [vmem:[%s4236_s7 + $0x350] ss:$8 sps:$4 sm:$0xff]  }
  0xb5   : > { %1474 = vmatmul.mubr.bf16.gmra.mxu0 %v4051_v7  ;;  %1698 = vmatmul.mubr.bf16.gmra.mxu1 %v4052_v8  ;;  %v4125_v7 = vld [vmem:[%s4236_s7 + $0x1a4] ss:$8 sps:$4 sm:$0xff]  }
  0xb6   : > { %1481 = vmatprep.mubr.bf16.mxu0 %v4053_v9  ;;  %1705 = vmatprep.mubr.bf16.mxu1 %v4055_v10  ;;  %v4127_v8 = vld [vmem:[%s4236_s7 + $0x364] ss:$8 sps:$4 sm:$0xff]  }
  0xbd   : > { %1482 = vmatmul.mubr.bf16.gmra.mxu0 %v4057_v11  ;;  %1706 = vmatmul.mubr.bf16.gmra.mxu1 %v4058_v12 }
  0xbe   : > { %1489 = vmatprep.mubr.bf16.mxu0 %v4059_v13  ;;  %1713 = vmatprep.mubr.bf16.mxu1 %v4061_v14 }
  0xc5   : > { %1490 = vmatmul.mubr.bf16.gmra.mxu0 %v4063_v15  ;;  %1714 = vmatmul.mubr.bf16.gmra.mxu1 %v4064_v16 }
  0xc6   : > { %1497 = vmatprep.mubr.bf16.mxu0 %v4065_v17  ;;  %1721 = vmatprep.mubr.bf16.mxu1 %v4067_v18 }
  0xcd   : > { %1498 = vmatmul.mubr.bf16.gmra.mxu0 %v4069_v19  ;;  %1722 = vmatmul.mubr.bf16.gmra.mxu1 %v4070_v20 }
  0xce   : > { %1505 = vmatprep.mubr.bf16.mxu0 %v4071_v21  ;;  %1729 = vmatprep.mubr.bf16.mxu1 %v4073_v22 }
  0xd5   : > { %1506 = vmatmul.mubr.bf16.gmra.mxu0 %v4075_v23  ;;  %1730 = vmatmul.mubr.bf16.gmra.mxu1 %v4076_v24 }
  0xd6   : > { %1513 = vmatprep.mubr.bf16.mxu0 %v4077_v25  ;;  %1737 = vmatprep.mubr.bf16.mxu1 %v4079_v26 }
  0xdd   : > { %1514 = vmatmul.mubr.bf16.gmra.mxu0 %v4081_v27  ;;  %1738 = vmatmul.mubr.bf16.gmra.mxu1 %v4082_v28 }
  0xde   : > { %1521 = vmatprep.mubr.bf16.mxu0 %v4083_v29  ;;  %1745 = vmatprep.mubr.bf16.mxu1 %v4085_v30  ;;  %v4129_v29 = vld [vmem:[%s4236_s7 + $0x1a0] ss:$8 sps:$4 sm:$0xff]  }
  0xdf   : > { %v4130_v30 = vld [vmem:[%s4236_s7 + $0x360] ss:$8 sps:$4 sm:$0xff]  }
  0xe5   : > { %1522 = vmatmul.mubr.bf16.gmra.mxu0 %v4087_v31  ;;  %1746 = vmatmul.mubr.bf16.gmra.mxu1 %v4088_v32 }
  0xe6   : > { %1529 = vmatprep.mubr.bf16.mxu0 %v4089_v33  ;;  %1753 = vmatprep.mubr.bf16.mxu1 %v4091_v34  ;;  %v4131_v33 = vld [vmem:[%s4236_s7 + $0x1b4] ss:$8 sps:$4 sm:$0xff]  }
  0xe7   : > { %v4133_v34 = vld [vmem:[%s4236_s7 + $0x374] ss:$8 sps:$4 sm:$0xff]  }
  0xed   : > { %1530 = vmatmul.mubr.bf16.gmra.mxu0 %v4093_v35  ;;  %1754 = vmatmul.mubr.bf16.gmra.mxu1 %v4094_v36 }
  0xee   : > { %1537 = vmatprep.mubr.bf16.mxu0 %v4095_v37  ;;  %1761 = vmatprep.mubr.bf16.mxu1 %v4097_v38 }
  0xf5   : > { %1538 = vmatmul.mubr.bf16.gmra.mxu0 %v4099_v39  ;;  %1762 = vmatmul.mubr.bf16.gmra.mxu1 %v4100_v40 }
  0xf6   : > { %1545 = vmatprep.mubr.bf16.mxu0 %v4101_v41  ;;  %1769 = vmatprep.mubr.bf16.mxu1 %v4103_v42 }
  0xfd   : > { %1546 = vmatmul.mubr.bf16.gmra.mxu0 %v4105_v43  ;;  %1770 = vmatmul.mubr.bf16.gmra.mxu1 %v4106_v44 }
  0xfe   : > { %1553 = vmatprep.mubr.bf16.mxu0 %v4107_v45  ;;  %1777 = vmatprep.mubr.bf16.mxu1 %v4109_v46 }
 0x105   : > { %1554 = vmatmul.mubr.bf16.gmra.mxu0 %v4111_v47  ;;  %1778 = vmatmul.mubr.bf16.gmra.mxu1 %v4112_v48 }
 0x106   : > { %1561 = vmatprep.mubr.bf16.mxu0 %v4113_v49  ;;  %1785 = vmatprep.mubr.bf16.mxu1 %v4115_v50 }
 0x10d   : > { %v1371_v56 = vpop.f32.mrf.mxu0  ;;  %1562 = vmatmul.mubr.bf16.gmra.mxu0 %v4117_v51  ;;  %v1595_v57 = vpop.f32.mrf.mxu1  ;;  %1786 = vmatmul.mubr.bf16.gmra.mxu1 %v4118_v52 }
 0x10e   : > { %v2164_v58 = vmul.f32 %v4400_v55, %v1371_v56  ;;  %v2220_v60 = vmul.f32 %v4400_v55, %v1595_v57  ;;  %1569 = vmatprep.mubr.bf16.mxu0 %v4119_v53  ;;  %1793 = vmatprep.mubr.bf16.mxu1 %v4121_v54  ;;  %v4135_v56 = vld [vmem:[%s4236_s7 + $0x1b0] ss:$8 sps:$4 sm:$0xff]  }
 0x10f   : > { %v1373_v61 = vpop.f32.mrf.mxu0  ;;  %v1597_v62 = vpop.f32.mrf.mxu1  ;;  %v4136_v57 = vld [vmem:[%s4236_s7 + $0x370] ss:$8 sps:$4 sm:$0xff]  }
 0x110   : > { %v2283_v63 = vadd.f32 %v4406_v59, %v2164_v58  ;;  %v2339_v0 = vadd.f32 %v4406_v59, %v2220_v60 }
 0x111   : > { %v1374_v1 = vpop.f32.mrf.mxu0  ;;  %v1598_v2 = vpop.f32.mrf.mxu1 }
 0x112   : > { %v2165_v5 = vmul.f32 %v4400_v55, %v1374_v1  ;;  %v2221_v6 = vmul.f32 %v4400_v55, %v1598_v2  ;;  %v2395_v13 = vmax.f32 %v2283_v63, 0.0  ;;  %v2451_v14 = vmax.f32 %v2339_v0, 0.0 }
 0x113   : > { %v1376_v9 = vpop.f32.mrf.mxu0  ;;  %v1600_v10 = vpop.f32.mrf.mxu1 }
 0x114   : > { %v2284_v11 = vadd.f32 %v4406_v59, %v2165_v5  ;;  %v2340_v12 = vadd.f32 %v4406_v59, %v2221_v6 }
 0x115   : > { %v1379_v15 = vpop.f32.mrf.mxu0  ;;  %1570 = vmatmul.mubr.bf16.gmra.mxu0 %v4123_v3  ;;  %v1603_v16 = vpop.f32.mrf.mxu1  ;;  %1794 = vmatmul.mubr.bf16.gmra.mxu1 %v4124_v4 }
 0x116   : > { %v2396_v17 = vmax.f32 %v2284_v11, 0.0  ;;  %v2452_v18 = vmax.f32 %v2340_v12, 0.0  ;;  %v2166_v19 = vmul.f32 %v4400_v55, %v1379_v15  ;;  %v2222_v20 = vmul.f32 %v4400_v55, %v1603_v16  ;;  %1577 = vmatprep.mubr.bf16.mxu0 %v4125_v7  ;;  %1801 = vmatprep.mubr.bf16.mxu1 %v4127_v8 }
 0x117   : > { %v1381_v21 = vpop.f32.mrf.mxu0  ;;  %v1605_v22 = vpop.f32.mrf.mxu1 }
 0x118   : > { %v3564_v23 = vpack.c.bf16 %v2396_v17, %v2395_v13  ;;  %v3704_v24 = vpack.c.bf16 %v2452_v18, %v2451_v14  ;;  %v2285_v25 = vadd.f32 %v4406_v59, %v2166_v19  ;;  %v2341_v26 = vadd.f32 %v4406_v59, %v2222_v20 }
 0x119   : > { %v1382_v27 = vpop.f32.mrf.mxu0  ;;  %v1606_v28 = vpop.f32.mrf.mxu1 }
 0x11a   : > { %3565 = vst [vmem:[%s4425_s15] sm:$0xff] %v3564_v23   ;;  %3868 = vst [vmem:[%s4425_s15 + $0xe0] sm:$0xff] %v3704_v24   ;;  %v2167_v31 = vmul.f32 %v4400_v55, %v1382_v27  ;;  %v2223_v32 = vmul.f32 %v4400_v55, %v1606_v28  ;;  %v2397_v39 = vmax.f32 %v2285_v25, 0.0  ;;  %v2453_v40 = vmax.f32 %v2341_v26, 0.0 }
 0x11b   : > { %v1384_v35 = vpop.f32.mrf.mxu0  ;;  %v1608_v36 = vpop.f32.mrf.mxu1 }
 0x11c   : > { %v2286_v37 = vadd.f32 %v4406_v59, %v2167_v31  ;;  %v2342_v38 = vadd.f32 %v4406_v59, %v2223_v32 }
 0x11d   : > { %v1387_v41 = vpop.f32.mrf.mxu0  ;;  %1578 = vmatmul.mubr.bf16.gmra.mxu0 %v4129_v29  ;;  %v1611_v42 = vpop.f32.mrf.mxu1  ;;  %1802 = vmatmul.mubr.bf16.gmra.mxu1 %v4130_v30 }
 0x11e   : > { %v2398_v43 = vmax.f32 %v2286_v37, 0.0  ;;  %v2454_v44 = vmax.f32 %v2342_v38, 0.0  ;;  %v2168_v45 = vmul.f32 %v4400_v55, %v1387_v41  ;;  %v2224_v46 = vmul.f32 %v4400_v55, %v1611_v42  ;;  %1585 = vmatprep.mubr.bf16.mxu0 %v4131_v33  ;;  %1809 = vmatprep.mubr.bf16.mxu1 %v4133_v34 }
 0x11f   : > { %v1389_v47 = vpop.f32.mrf.mxu0  ;;  %v1613_v48 = vpop.f32.mrf.mxu1 }
 0x120   : > { %v3569_v49 = vpack.c.bf16 %v2398_v43, %v2397_v39  ;;  %v3709_v50 = vpack.c.bf16 %v2454_v44, %v2453_v40  ;;  %v2287_v51 = vadd.f32 %v4406_v59, %v2168_v45  ;;  %v2343_v52 = vadd.f32 %v4406_v59, %v2224_v46 }
 0x121   : > { %v1390_v53 = vpop.f32.mrf.mxu0  ;;  %v1614_v54 = vpop.f32.mrf.mxu1 }
 0x122   : > { %3841 = vst [vmem:[%s4425_s15 + $0x8] sm:$0xff] %v3569_v49   ;;  %3869 = vst [vmem:[%s4425_s15 + $0xe8] sm:$0xff] %v3709_v50   ;;  %v2169_v58 = vmul.f32 %v4400_v55, %v1390_v53  ;;  %v2225_v60 = vmul.f32 %v4400_v55, %v1614_v54  ;;  %v2399_v1 = vmax.f32 %v2287_v51, 0.0  ;;  %v2455_v2 = vmax.f32 %v2343_v52, 0.0 }
 0x123   : > { %v1392_v61 = vpop.f32.mrf.mxu0  ;;  %v1616_v62 = vpop.f32.mrf.mxu1 }
 0x124   : > { %v2288_v63 = vadd.f32 %v4406_v59, %v2169_v58  ;;  %v2344_v0 = vadd.f32 %v4406_v59, %v2225_v60 }
 0x125   : > { %v1395_v3 = vpop.f32.mrf.mxu0  ;;  %1586 = vmatmul.mubr.bf16.gmra.mxu0 %v4135_v56  ;;  %v1619_v4 = vpop.f32.mrf.mxu1  ;;  %1810 = vmatmul.mubr.bf16.gmra.mxu1 %v4136_v57 }
 0x126   : > { %v2400_v5 = vmax.f32 %v2288_v63, 0.0  ;;  %v2456_v6 = vmax.f32 %v2344_v0, 0.0  ;;  %v2170_v7 = vmul.f32 %v4400_v55, %v1395_v3  ;;  %v2226_v8 = vmul.f32 %v4400_v55, %v1619_v4 }
 0x127   : > { %v1397_v9 = vpop.f32.mrf.mxu0  ;;  %v1621_v10 = vpop.f32.mrf.mxu1 }
 0x128   : > { %v3574_v11 = vpack.c.bf16 %v2400_v5, %v2399_v1  ;;  %v3714_v12 = vpack.c.bf16 %v2456_v6, %v2455_v2  ;;  %v2289_v13 = vadd.f32 %v4406_v59, %v2170_v7  ;;  %v2345_v14 = vadd.f32 %v4406_v59, %v2226_v8 }
 0x129   : > { %v1398_v15 = vpop.f32.mrf.mxu0  ;;  %v1622_v16 = vpop.f32.mrf.mxu1 }
 0x12a   : > { %3842 = vst [vmem:[%s4425_s15 + $0x10] sm:$0xff] %v3574_v11   ;;  %3870 = vst [vmem:[%s4425_s15 + $0xf0] sm:$0xff] %v3714_v12   ;;  %v2171_v17 = vmul.f32 %v4400_v55, %v1398_v15  ;;  %v2227_v18 = vmul.f32 %v4400_v55, %v1622_v16  ;;  %v2401_v23 = vmax.f32 %v2289_v13, 0.0  ;;  %v2457_v24 = vmax.f32 %v2345_v14, 0.0 }
 0x12b   : > { %v1400_v19 = vpop.f32.mrf.mxu0  ;;  %v1624_v20 = vpop.f32.mrf.mxu1 }
 0x12c   : > { %v2290_v21 = vadd.f32 %v4406_v59, %v2171_v17  ;;  %v2346_v22 = vadd.f32 %v4406_v59, %v2227_v18 }
 0x12d   : > { %v1403_v25 = vpop.f32.mrf.mxu0  ;;  %v1627_v26 = vpop.f32.mrf.mxu1 }
 0x12e   : > { %v2402_v27 = vmax.f32 %v2290_v21, 0.0  ;;  %v2458_v28 = vmax.f32 %v2346_v22, 0.0  ;;  %v2172_v29 = vmul.f32 %v4400_v55, %v1403_v25  ;;  %v2228_v30 = vmul.f32 %v4400_v55, %v1627_v26 }
 0x12f   : > { %v1405_v31 = vpop.f32.mrf.mxu0  ;;  %v1629_v32 = vpop.f32.mrf.mxu1 }
 0x130   : > { %v3579_v33 = vpack.c.bf16 %v2402_v27, %v2401_v23  ;;  %v3719_v34 = vpack.c.bf16 %v2458_v28, %v2457_v24  ;;  %v2291_v35 = vadd.f32 %v4406_v59, %v2172_v29  ;;  %v2347_v36 = vadd.f32 %v4406_v59, %v2228_v30 }
 0x131   : > { %v1406_v37 = vpop.f32.mrf.mxu0  ;;  %v1630_v38 = vpop.f32.mrf.mxu1 }
 0x132   : > { %3843 = vst [vmem:[%s4425_s15 + $0x18] sm:$0xff] %v3579_v33   ;;  %3871 = vst [vmem:[%s4425_s15 + $0xf8] sm:$0xff] %v3719_v34   ;;  %v2173_v39 = vmul.f32 %v4400_v55, %v1406_v37  ;;  %v2229_v40 = vmul.f32 %v4400_v55, %v1630_v38  ;;  %v2403_v45 = vmax.f32 %v2291_v35, 0.0  ;;  %v2459_v46 = vmax.f32 %v2347_v36, 0.0 }
 0x133   : > { %v1408_v41 = vpop.f32.mrf.mxu0  ;;  %v1632_v42 = vpop.f32.mrf.mxu1 }
 0x134   : > { %v2292_v43 = vadd.f32 %v4406_v59, %v2173_v39  ;;  %v2348_v44 = vadd.f32 %v4406_v59, %v2229_v40 }
 0x135   : > { %v1411_v47 = vpop.f32.mrf.mxu0  ;;  %v1635_v48 = vpop.f32.mrf.mxu1 }
 0x136   : > { %v2404_v49 = vmax.f32 %v2292_v43, 0.0  ;;  %v2460_v50 = vmax.f32 %v2348_v44, 0.0  ;;  %v2174_v51 = vmul.f32 %v4400_v55, %v1411_v47  ;;  %v2230_v52 = vmul.f32 %v4400_v55, %v1635_v48 }
 0x137   : > { %v1413_v53 = vpop.f32.mrf.mxu0  ;;  %v1637_v54 = vpop.f32.mrf.mxu1 }
 0x138   : > { %v3584_v56 = vpack.c.bf16 %v2404_v49, %v2403_v45  ;;  %v3724_v57 = vpack.c.bf16 %v2460_v50, %v2459_v46  ;;  %v2293_v58 = vadd.f32 %v4406_v59, %v2174_v51  ;;  %v2349_v60 = vadd.f32 %v4406_v59, %v2230_v52 }
 0x139   : > { %v1414_v61 = vpop.f32.mrf.mxu0  ;;  %v1638_v62 = vpop.f32.mrf.mxu1 }
 0x13a   : > { %3844 = vst [vmem:[%s4425_s15 + $0x20] sm:$0xff] %v3584_v56   ;;  %3872 = vst [vmem:[%s4425_s15 + $0x100] sm:$0xff] %v3724_v57   ;;  %v2175_v63 = vmul.f32 %v4400_v55, %v1414_v61  ;;  %v2231_v0 = vmul.f32 %v4400_v55, %v1638_v62  ;;  %v2405_v5 = vmax.f32 %v2293_v58, 0.0  ;;  %v2461_v6 = vmax.f32 %v2349_v60, 0.0 }
 0x13b   : > { %v1416_v1 = vpop.f32.mrf.mxu0  ;;  %v1640_v2 = vpop.f32.mrf.mxu1 }
 0x13c   : > { %v2294_v3 = vadd.f32 %v4406_v59, %v2175_v63  ;;  %v2350_v4 = vadd.f32 %v4406_v59, %v2231_v0 }
 0x13d   : > { %v1419_v7 = vpop.f32.mrf.mxu0  ;;  %v1643_v8 = vpop.f32.mrf.mxu1 }
 0x13e   : > { %v2406_v9 = vmax.f32 %v2294_v3, 0.0  ;;  %v2462_v10 = vmax.f32 %v2350_v4, 0.0  ;;  %v2176_v11 = vmul.f32 %v4400_v55, %v1419_v7  ;;  %v2232_v12 = vmul.f32 %v4400_v55, %v1643_v8 }
 0x13f   : > { %v1421_v13 = vpop.f32.mrf.mxu0  ;;  %v1645_v14 = vpop.f32.mrf.mxu1 }
 0x140   : > { %v3589_v15 = vpack.c.bf16 %v2406_v9, %v2405_v5  ;;  %v3729_v16 = vpack.c.bf16 %v2462_v10, %v2461_v6  ;;  %v2295_v17 = vadd.f32 %v4406_v59, %v2176_v11  ;;  %v2351_v18 = vadd.f32 %v4406_v59, %v2232_v12 }
 0x141   : > { %v1422_v19 = vpop.f32.mrf.mxu0  ;;  %v1646_v20 = vpop.f32.mrf.mxu1 }
 0x142   : > { %3845 = vst [vmem:[%s4425_s15 + $0x28] sm:$0xff] %v3589_v15   ;;  %3873 = vst [vmem:[%s4425_s15 + $0x108] sm:$0xff] %v3729_v16   ;;  %v2177_v21 = vmul.f32 %v4400_v55, %v1422_v19  ;;  %v2233_v22 = vmul.f32 %v4400_v55, %v1646_v20  ;;  %v2407_v27 = vmax.f32 %v2295_v17, 0.0  ;;  %v2463_v28 = vmax.f32 %v2351_v18, 0.0 }
 0x143   : > { %v1424_v23 = vpop.f32.mrf.mxu0  ;;  %v1648_v24 = vpop.f32.mrf.mxu1 }
 0x144   : > { %v2296_v25 = vadd.f32 %v4406_v59, %v2177_v21  ;;  %v2352_v26 = vadd.f32 %v4406_v59, %v2233_v22 }
 0x145   : > { %v1427_v29 = vpop.f32.mrf.mxu0  ;;  %v1651_v30 = vpop.f32.mrf.mxu1 }
 0x146   : > { %v2408_v31 = vmax.f32 %v2296_v25, 0.0  ;;  %v2464_v32 = vmax.f32 %v2352_v26, 0.0  ;;  %v2178_v33 = vmul.f32 %v4400_v55, %v1427_v29  ;;  %v2234_v34 = vmul.f32 %v4400_v55, %v1651_v30 }
 0x147   : > { %v1429_v35 = vpop.f32.mrf.mxu0  ;;  %v1653_v36 = vpop.f32.mrf.mxu1 }
 0x148   : > { %v3594_v37 = vpack.c.bf16 %v2408_v31, %v2407_v27  ;;  %v3734_v38 = vpack.c.bf16 %v2464_v32, %v2463_v28  ;;  %v2297_v39 = vadd.f32 %v4406_v59, %v2178_v33  ;;  %v2353_v40 = vadd.f32 %v4406_v59, %v2234_v34 }
 0x149   : > { %v1430_v41 = vpop.f32.mrf.mxu0  ;;  %v1654_v42 = vpop.f32.mrf.mxu1 }
 0x14a   : > { %3846 = vst [vmem:[%s4425_s15 + $0x30] sm:$0xff] %v3594_v37   ;;  %3874 = vst [vmem:[%s4425_s15 + $0x110] sm:$0xff] %v3734_v38   ;;  %v2179_v43 = vmul.f32 %v4400_v55, %v1430_v41  ;;  %v2235_v44 = vmul.f32 %v4400_v55, %v1654_v42  ;;  %v2409_v49 = vmax.f32 %v2297_v39, 0.0  ;;  %v2465_v50 = vmax.f32 %v2353_v40, 0.0 }
 0x14b   : > { %v1432_v45 = vpop.f32.mrf.mxu0  ;;  %v1656_v46 = vpop.f32.mrf.mxu1 }
 0x14c   : > { %v2298_v47 = vadd.f32 %v4406_v59, %v2179_v43  ;;  %v2354_v48 = vadd.f32 %v4406_v59, %v2235_v44 }
 0x14d   : > { %v1435_v51 = vpop.f32.mrf.mxu0  ;;  %v1659_v52 = vpop.f32.mrf.mxu1 }
 0x14e   : > { %v2410_v53 = vmax.f32 %v2298_v47, 0.0  ;;  %v2466_v54 = vmax.f32 %v2354_v48, 0.0  ;;  %v2180_v56 = vmul.f32 %v4400_v55, %v1435_v51  ;;  %v2236_v57 = vmul.f32 %v4400_v55, %v1659_v52 }
 0x14f   : > { %v1437_v58 = vpop.f32.mrf.mxu0  ;;  %v1661_v60 = vpop.f32.mrf.mxu1 }
 0x150   : > { %v3599_v61 = vpack.c.bf16 %v2410_v53, %v2409_v49  ;;  %v3739_v62 = vpack.c.bf16 %v2466_v54, %v2465_v50  ;;  %v2299_v63 = vadd.f32 %v4406_v59, %v2180_v56  ;;  %v2355_v0 = vadd.f32 %v4406_v59, %v2236_v57 }
 0x151   : > { %v1438_v1 = vpop.f32.mrf.mxu0  ;;  %v1662_v2 = vpop.f32.mrf.mxu1 }
 0x152   : > { %3847 = vst [vmem:[%s4425_s15 + $0x38] sm:$0xff] %v3599_v61   ;;  %3875 = vst [vmem:[%s4425_s15 + $0x118] sm:$0xff] %v3739_v62   ;;  %v2181_v3 = vmul.f32 %v4400_v55, %v1438_v1  ;;  %v2237_v4 = vmul.f32 %v4400_v55, %v1662_v2  ;;  %v2411_v9 = vmax.f32 %v2299_v63, 0.0  ;;  %v2467_v10 = vmax.f32 %v2355_v0, 0.0 }
 0x153   : > { %v1440_v5 = vpop.f32.mrf.mxu0  ;;  %v1664_v6 = vpop.f32.mrf.mxu1 }
 0x154   : > { %v2300_v7 = vadd.f32 %v4406_v59, %v2181_v3  ;;  %v2356_v8 = vadd.f32 %v4406_v59, %v2237_v4 }
 0x155   : > { %v1443_v11 = vpop.f32.mrf.mxu0  ;;  %v1667_v12 = vpop.f32.mrf.mxu1 }
 0x156   : > { %v2412_v13 = vmax.f32 %v2300_v7, 0.0  ;;  %v2468_v14 = vmax.f32 %v2356_v8, 0.0  ;;  %v2182_v15 = vmul.f32 %v4400_v55, %v1443_v11  ;;  %v2238_v16 = vmul.f32 %v4400_v55, %v1667_v12 }
 0x157   : > { %v1445_v17 = vpop.f32.mrf.mxu0  ;;  %v1669_v18 = vpop.f32.mrf.mxu1 }
 0x158   : > { %v3604_v19 = vpack.c.bf16 %v2412_v13, %v2411_v9  ;;  %v3744_v20 = vpack.c.bf16 %v2468_v14, %v2467_v10  ;;  %v2301_v21 = vadd.f32 %v4406_v59, %v2182_v15  ;;  %v2357_v22 = vadd.f32 %v4406_v59, %v2238_v16 }
 0x159   : > { %v1446_v23 = vpop.f32.mrf.mxu0  ;;  %v1670_v24 = vpop.f32.mrf.mxu1 }
 0x15a   : > { %3848 = vst [vmem:[%s4425_s15 + $0x40] sm:$0xff] %v3604_v19   ;;  %3876 = vst [vmem:[%s4425_s15 + $0x120] sm:$0xff] %v3744_v20   ;;  %v2183_v25 = vmul.f32 %v4400_v55, %v1446_v23  ;;  %v2239_v26 = vmul.f32 %v4400_v55, %v1670_v24  ;;  %v2413_v31 = vmax.f32 %v2301_v21, 0.0  ;;  %v2469_v32 = vmax.f32 %v2357_v22, 0.0 }
 0x15b   : > { %v1448_v27 = vpop.f32.mrf.mxu0  ;;  %v1672_v28 = vpop.f32.mrf.mxu1 }
 0x15c   : > { %v2302_v29 = vadd.f32 %v4406_v59, %v2183_v25  ;;  %v2358_v30 = vadd.f32 %v4406_v59, %v2239_v26 }
 0x15d   : > { %v1451_v33 = vpop.f32.mrf.mxu0  ;;  %v1675_v34 = vpop.f32.mrf.mxu1 }
 0x15e   : > { %v2414_v35 = vmax.f32 %v2302_v29, 0.0  ;;  %v2470_v36 = vmax.f32 %v2358_v30, 0.0  ;;  %v2184_v37 = vmul.f32 %v4400_v55, %v1451_v33  ;;  %v2240_v38 = vmul.f32 %v4400_v55, %v1675_v34 }
 0x15f   : > { %v1453_v39 = vpop.f32.mrf.mxu0  ;;  %v1677_v40 = vpop.f32.mrf.mxu1 }
 0x160   : > { %v3609_v41 = vpack.c.bf16 %v2414_v35, %v2413_v31  ;;  %v3749_v42 = vpack.c.bf16 %v2470_v36, %v2469_v32  ;;  %v2303_v43 = vadd.f32 %v4406_v59, %v2184_v37  ;;  %v2359_v44 = vadd.f32 %v4406_v59, %v2240_v38 }
 0x161   : > { %v1454_v45 = vpop.f32.mrf.mxu0  ;;  %v1678_v46 = vpop.f32.mrf.mxu1 }
 0x162   : > { %3849 = vst [vmem:[%s4425_s15 + $0x48] sm:$0xff] %v3609_v41   ;;  %3877 = vst [vmem:[%s4425_s15 + $0x128] sm:$0xff] %v3749_v42   ;;  %v2185_v47 = vmul.f32 %v4400_v55, %v1454_v45  ;;  %v2241_v48 = vmul.f32 %v4400_v55, %v1678_v46  ;;  %v2415_v53 = vmax.f32 %v2303_v43, 0.0  ;;  %v2471_v54 = vmax.f32 %v2359_v44, 0.0 }
 0x163   : > { %v1456_v49 = vpop.f32.mrf.mxu0  ;;  %v1680_v50 = vpop.f32.mrf.mxu1 }
 0x164   : > { %v2304_v51 = vadd.f32 %v4406_v59, %v2185_v47  ;;  %v2360_v52 = vadd.f32 %v4406_v59, %v2241_v48 }
 0x165   : > { %v1459_v56 = vpop.f32.mrf.mxu0  ;;  %v1683_v57 = vpop.f32.mrf.mxu1 }
 0x166   : > { %v2416_v58 = vmax.f32 %v2304_v51, 0.0  ;;  %v2472_v60 = vmax.f32 %v2360_v52, 0.0  ;;  %v2186_v61 = vmul.f32 %v4400_v55, %v1459_v56  ;;  %v2242_v62 = vmul.f32 %v4400_v55, %v1683_v57 }
 0x167   : > { %v1461_v63 = vpop.f32.mrf.mxu0  ;;  %v1685_v0 = vpop.f32.mrf.mxu1 }
 0x168   : > { %v3614_v1 = vpack.c.bf16 %v2416_v58, %v2415_v53  ;;  %v3754_v2 = vpack.c.bf16 %v2472_v60, %v2471_v54  ;;  %v2305_v3 = vadd.f32 %v4406_v59, %v2186_v61  ;;  %v2361_v4 = vadd.f32 %v4406_v59, %v2242_v62 }
 0x169   : > { %v1462_v5 = vpop.f32.mrf.mxu0  ;;  %v1686_v6 = vpop.f32.mrf.mxu1 }
 0x16a   : > { %3850 = vst [vmem:[%s4425_s15 + $0x50] sm:$0xff] %v3614_v1   ;;  %3878 = vst [vmem:[%s4425_s15 + $0x130] sm:$0xff] %v3754_v2   ;;  %v2187_v7 = vmul.f32 %v4400_v55, %v1462_v5  ;;  %v2243_v8 = vmul.f32 %v4400_v55, %v1686_v6  ;;  %v2417_v13 = vmax.f32 %v2305_v3, 0.0  ;;  %v2473_v14 = vmax.f32 %v2361_v4, 0.0 }
 0x16b   : > { %v1464_v9 = vpop.f32.mrf.mxu0  ;;  %v1688_v10 = vpop.f32.mrf.mxu1 }
 0x16c   : > { %v2306_v11 = vadd.f32 %v4406_v59, %v2187_v7  ;;  %v2362_v12 = vadd.f32 %v4406_v59, %v2243_v8 }
 0x16d   : > { %v1467_v15 = vpop.f32.mrf.mxu0  ;;  %v1691_v16 = vpop.f32.mrf.mxu1 }
 0x16e   : > { %v2418_v17 = vmax.f32 %v2306_v11, 0.0  ;;  %v2474_v18 = vmax.f32 %v2362_v12, 0.0  ;;  %v2188_v19 = vmul.f32 %v4400_v55, %v1467_v15  ;;  %v2244_v20 = vmul.f32 %v4400_v55, %v1691_v16 }
 0x16f   : > { %v1469_v21 = vpop.f32.mrf.mxu0  ;;  %v1693_v22 = vpop.f32.mrf.mxu1 }
 0x170   : > { %v3619_v23 = vpack.c.bf16 %v2418_v17, %v2417_v13  ;;  %v3759_v24 = vpack.c.bf16 %v2474_v18, %v2473_v14  ;;  %v2307_v25 = vadd.f32 %v4406_v59, %v2188_v19  ;;  %v2363_v26 = vadd.f32 %v4406_v59, %v2244_v20 }
 0x171   : > { %v1470_v27 = vpop.f32.mrf.mxu0  ;;  %v1694_v28 = vpop.f32.mrf.mxu1 }
 0x172   : > { %3851 = vst [vmem:[%s4425_s15 + $0x58] sm:$0xff] %v3619_v23   ;;  %3879 = vst [vmem:[%s4425_s15 + $0x138] sm:$0xff] %v3759_v24   ;;  %v2189_v29 = vmul.f32 %v4400_v55, %v1470_v27  ;;  %v2245_v30 = vmul.f32 %v4400_v55, %v1694_v28  ;;  %v2419_v35 = vmax.f32 %v2307_v25, 0.0  ;;  %v2475_v36 = vmax.f32 %v2363_v26, 0.0 }
 0x173   : > { %v1472_v31 = vpop.f32.mrf.mxu0  ;;  %v1696_v32 = vpop.f32.mrf.mxu1 }
 0x174   : > { %v2308_v33 = vadd.f32 %v4406_v59, %v2189_v29  ;;  %v2364_v34 = vadd.f32 %v4406_v59, %v2245_v30 }
 0x175   : > { %v1475_v37 = vpop.f32.mrf.mxu0  ;;  %v1699_v38 = vpop.f32.mrf.mxu1 }
 0x176   : > { %v2420_v39 = vmax.f32 %v2308_v33, 0.0  ;;  %v2476_v40 = vmax.f32 %v2364_v34, 0.0  ;;  %v2190_v41 = vmul.f32 %v4400_v55, %v1475_v37  ;;  %v2246_v42 = vmul.f32 %v4400_v55, %v1699_v38 }
 0x177   : > { %v1477_v43 = vpop.f32.mrf.mxu0  ;;  %v1701_v44 = vpop.f32.mrf.mxu1 }
 0x178   : > { %v3624_v45 = vpack.c.bf16 %v2420_v39, %v2419_v35  ;;  %v3764_v46 = vpack.c.bf16 %v2476_v40, %v2475_v36  ;;  %v2309_v47 = vadd.f32 %v4406_v59, %v2190_v41  ;;  %v2365_v48 = vadd.f32 %v4406_v59, %v2246_v42 }
 0x179   : > { %v1478_v49 = vpop.f32.mrf.mxu0  ;;  %v1702_v50 = vpop.f32.mrf.mxu1 }
 0x17a   : > { %3852 = vst [vmem:[%s4425_s15 + $0x60] sm:$0xff] %v3624_v45   ;;  %3880 = vst [vmem:[%s4425_s15 + $0x140] sm:$0xff] %v3764_v46   ;;  %v2191_v51 = vmul.f32 %v4400_v55, %v1478_v49  ;;  %v2247_v52 = vmul.f32 %v4400_v55, %v1702_v50  ;;  %v2421_v58 = vmax.f32 %v2309_v47, 0.0  ;;  %v2477_v60 = vmax.f32 %v2365_v48, 0.0 }
 0x17b   : > { %v1480_v53 = vpop.f32.mrf.mxu0  ;;  %v1704_v54 = vpop.f32.mrf.mxu1 }
 0x17c   : > { %v2310_v56 = vadd.f32 %v4406_v59, %v2191_v51  ;;  %v2366_v57 = vadd.f32 %v4406_v59, %v2247_v52 }
 0x17d   : > { %v1483_v61 = vpop.f32.mrf.mxu0  ;;  %v1707_v62 = vpop.f32.mrf.mxu1 }
 0x17e   : > { %v2422_v63 = vmax.f32 %v2310_v56, 0.0  ;;  %v2478_v0 = vmax.f32 %v2366_v57, 0.0  ;;  %v2192_v1 = vmul.f32 %v4400_v55, %v1483_v61  ;;  %v2248_v2 = vmul.f32 %v4400_v55, %v1707_v62 }
 0x17f   : > { %v1485_v3 = vpop.f32.mrf.mxu0  ;;  %v1709_v4 = vpop.f32.mrf.mxu1 }
 0x180   : > { %v3629_v5 = vpack.c.bf16 %v2422_v63, %v2421_v58  ;;  %v3769_v6 = vpack.c.bf16 %v2478_v0, %v2477_v60  ;;  %v2311_v7 = vadd.f32 %v4406_v59, %v2192_v1  ;;  %v2367_v8 = vadd.f32 %v4406_v59, %v2248_v2 }
 0x181   : > { %v1486_v9 = vpop.f32.mrf.mxu0  ;;  %v1710_v10 = vpop.f32.mrf.mxu1 }
 0x182   : > { %3853 = vst [vmem:[%s4425_s15 + $0x68] sm:$0xff] %v3629_v5   ;;  %3881 = vst [vmem:[%s4425_s15 + $0x148] sm:$0xff] %v3769_v6   ;;  %v2193_v11 = vmul.f32 %v4400_v55, %v1486_v9  ;;  %v2249_v12 = vmul.f32 %v4400_v55, %v1710_v10  ;;  %v2423_v17 = vmax.f32 %v2311_v7, 0.0  ;;  %v2479_v18 = vmax.f32 %v2367_v8, 0.0 }
 0x183   : > { %v1488_v13 = vpop.f32.mrf.mxu0  ;;  %v1712_v14 = vpop.f32.mrf.mxu1 }
 0x184   : > { %v2312_v15 = vadd.f32 %v4406_v59, %v2193_v11  ;;  %v2368_v16 = vadd.f32 %v4406_v59, %v2249_v12 }
 0x185   : > { %v1491_v19 = vpop.f32.mrf.mxu0  ;;  %v1715_v20 = vpop.f32.mrf.mxu1 }
 0x186   : > { %v2424_v21 = vmax.f32 %v2312_v15, 0.0  ;;  %v2480_v22 = vmax.f32 %v2368_v16, 0.0  ;;  %v2194_v23 = vmul.f32 %v4400_v55, %v1491_v19  ;;  %v2250_v24 = vmul.f32 %v4400_v55, %v1715_v20 }
 0x187   : > { %v1493_v25 = vpop.f32.mrf.mxu0  ;;  %v1717_v26 = vpop.f32.mrf.mxu1 }
 0x188   : > { %v3634_v27 = vpack.c.bf16 %v2424_v21, %v2423_v17  ;;  %v3774_v28 = vpack.c.bf16 %v2480_v22, %v2479_v18  ;;  %v2313_v29 = vadd.f32 %v4406_v59, %v2194_v23  ;;  %v2369_v30 = vadd.f32 %v4406_v59, %v2250_v24 }
 0x189   : > { %v1494_v31 = vpop.f32.mrf.mxu0  ;;  %v1718_v32 = vpop.f32.mrf.mxu1 }
 0x18a   : > { %3854 = vst [vmem:[%s4425_s15 + $0x70] sm:$0xff] %v3634_v27   ;;  %3882 = vst [vmem:[%s4425_s15 + $0x150] sm:$0xff] %v3774_v28   ;;  %v2195_v33 = vmul.f32 %v4400_v55, %v1494_v31  ;;  %v2251_v34 = vmul.f32 %v4400_v55, %v1718_v32  ;;  %v2425_v39 = vmax.f32 %v2313_v29, 0.0  ;;  %v2481_v40 = vmax.f32 %v2369_v30, 0.0 }
 0x18b   : > { %v1496_v35 = vpop.f32.mrf.mxu0  ;;  %v1720_v36 = vpop.f32.mrf.mxu1 }
 0x18c   : > { %v2314_v37 = vadd.f32 %v4406_v59, %v2195_v33  ;;  %v2370_v38 = vadd.f32 %v4406_v59, %v2251_v34 }
 0x18d   : > { %v1499_v41 = vpop.f32.mrf.mxu0  ;;  %v1723_v42 = vpop.f32.mrf.mxu1 }
 0x18e   : > { %v2426_v43 = vmax.f32 %v2314_v37, 0.0  ;;  %v2482_v44 = vmax.f32 %v2370_v38, 0.0  ;;  %v2196_v45 = vmul.f32 %v4400_v55, %v1499_v41  ;;  %v2252_v46 = vmul.f32 %v4400_v55, %v1723_v42 }
 0x18f   : > { %v1501_v47 = vpop.f32.mrf.mxu0  ;;  %v1725_v48 = vpop.f32.mrf.mxu1 }
 0x190   : > { %v3639_v49 = vpack.c.bf16 %v2426_v43, %v2425_v39  ;;  %v3779_v50 = vpack.c.bf16 %v2482_v44, %v2481_v40  ;;  %v2315_v51 = vadd.f32 %v4406_v59, %v2196_v45  ;;  %v2371_v52 = vadd.f32 %v4406_v59, %v2252_v46 }
 0x191   : > { %v1502_v53 = vpop.f32.mrf.mxu0  ;;  %v1726_v54 = vpop.f32.mrf.mxu1 }
 0x192   : > { %3855 = vst [vmem:[%s4425_s15 + $0x78] sm:$0xff] %v3639_v49   ;;  %3883 = vst [vmem:[%s4425_s15 + $0x158] sm:$0xff] %v3779_v50   ;;  %v2197_v56 = vmul.f32 %v4400_v55, %v1502_v53  ;;  %v2253_v57 = vmul.f32 %v4400_v55, %v1726_v54  ;;  %v2427_v63 = vmax.f32 %v2315_v51, 0.0  ;;  %v2483_v0 = vmax.f32 %v2371_v52, 0.0 }
 0x193   : > { %v1504_v58 = vpop.f32.mrf.mxu0  ;;  %v1728_v60 = vpop.f32.mrf.mxu1 }
 0x194   : > { %v2316_v61 = vadd.f32 %v4406_v59, %v2197_v56  ;;  %v2372_v62 = vadd.f32 %v4406_v59, %v2253_v57 }
 0x195   : > { %v1507_v1 = vpop.f32.mrf.mxu0  ;;  %v1731_v2 = vpop.f32.mrf.mxu1 }
 0x196   : > { %v2428_v3 = vmax.f32 %v2316_v61, 0.0  ;;  %v2484_v4 = vmax.f32 %v2372_v62, 0.0  ;;  %v2198_v5 = vmul.f32 %v4400_v55, %v1507_v1  ;;  %v2254_v6 = vmul.f32 %v4400_v55, %v1731_v2 }
 0x197   : > { %v1509_v7 = vpop.f32.mrf.mxu0  ;;  %v1733_v8 = vpop.f32.mrf.mxu1 }
 0x198   : > { %v3644_v9 = vpack.c.bf16 %v2428_v3, %v2427_v63  ;;  %v3784_v10 = vpack.c.bf16 %v2484_v4, %v2483_v0  ;;  %v2317_v11 = vadd.f32 %v4406_v59, %v2198_v5  ;;  %v2373_v12 = vadd.f32 %v4406_v59, %v2254_v6 }
 0x199   : > { %v1510_v13 = vpop.f32.mrf.mxu0  ;;  %v1734_v14 = vpop.f32.mrf.mxu1 }
 0x19a   : > { %3856 = vst [vmem:[%s4425_s15 + $0x80] sm:$0xff] %v3644_v9   ;;  %3884 = vst [vmem:[%s4425_s15 + $0x160] sm:$0xff] %v3784_v10   ;;  %v2199_v15 = vmul.f32 %v4400_v55, %v1510_v13  ;;  %v2255_v16 = vmul.f32 %v4400_v55, %v1734_v14  ;;  %v2429_v21 = vmax.f32 %v2317_v11, 0.0  ;;  %v2485_v22 = vmax.f32 %v2373_v12, 0.0 }
 0x19b   : > { %v1512_v17 = vpop.f32.mrf.mxu0  ;;  %v1736_v18 = vpop.f32.mrf.mxu1 }
 0x19c   : > { %v2318_v19 = vadd.f32 %v4406_v59, %v2199_v15  ;;  %v2374_v20 = vadd.f32 %v4406_v59, %v2255_v16 }
 0x19d   : > { %v1515_v23 = vpop.f32.mrf.mxu0  ;;  %v1739_v24 = vpop.f32.mrf.mxu1 }
 0x19e   : > { %v2430_v25 = vmax.f32 %v2318_v19, 0.0  ;;  %v2486_v26 = vmax.f32 %v2374_v20, 0.0  ;;  %v2200_v27 = vmul.f32 %v4400_v55, %v1515_v23  ;;  %v2256_v28 = vmul.f32 %v4400_v55, %v1739_v24  ;;  %v4630_v19 = vld [vmem:[%s4724_s2] ss:$0 sm:$0xff] }
 0x19f   : > { %v1517_v29 = vpop.f32.mrf.mxu0  ;;  %v1741_v30 = vpop.f32.mrf.mxu1  ;;  %v4637_v23 = vld [vmem:[%s4725_s3] ss:$0 sm:$0xff] }
 0x1a0   : > { %v3649_v31 = vpack.c.bf16 %v2430_v25, %v2429_v21  ;;  %v3789_v32 = vpack.c.bf16 %v2486_v26, %v2485_v22  ;;  %v2319_v33 = vadd.f32 %v4406_v59, %v2200_v27  ;;  %v2375_v34 = vadd.f32 %v4406_v59, %v2256_v28 }
 0x1a1   : > { %v1518_v35 = vpop.f32.mrf.mxu0  ;;  %v1742_v36 = vpop.f32.mrf.mxu1 }
 0x1a2   : > { %3857 = vst [vmem:[%s4425_s15 + $0x88] sm:$0xff] %v3649_v31   ;;  %3885 = vst [vmem:[%s4425_s15 + $0x168] sm:$0xff] %v3789_v32   ;;  %v2201_v37 = vmul.f32 %v4400_v55, %v1518_v35  ;;  %v2257_v38 = vmul.f32 %v4400_v55, %v1742_v36  ;;  %v2431_v43 = vmax.f32 %v2319_v33, 0.0  ;;  %v2487_v44 = vmax.f32 %v2375_v34, 0.0 }
 0x1a3   : > { %v1520_v39 = vpop.f32.mrf.mxu0  ;;  %v1744_v40 = vpop.f32.mrf.mxu1 }
 0x1a4   : > { %v2320_v41 = vadd.f32 %v4406_v59, %v2201_v37  ;;  %v2376_v42 = vadd.f32 %v4406_v59, %v2257_v38 }
 0x1a5   : > { %v1523_v45 = vpop.f32.mrf.mxu0  ;;  %v1747_v46 = vpop.f32.mrf.mxu1 }
 0x1a6   : > { %v2432_v47 = vmax.f32 %v2320_v41, 0.0  ;;  %v2488_v48 = vmax.f32 %v2376_v42, 0.0  ;;  %v2202_v49 = vmul.f32 %v4400_v55, %v1523_v45  ;;  %v2258_v50 = vmul.f32 %v4400_v55, %v1747_v46 }
 0x1a7   : > { %v1525_v51 = vpop.f32.mrf.mxu0  ;;  %v1749_v52 = vpop.f32.mrf.mxu1 }
 0x1a8   : > { %v3654_v53 = vpack.c.bf16 %v2432_v47, %v2431_v43  ;;  %v3794_v54 = vpack.c.bf16 %v2488_v48, %v2487_v44  ;;  %v2321_v56 = vadd.f32 %v4406_v59, %v2202_v49  ;;  %v2377_v57 = vadd.f32 %v4406_v59, %v2258_v50 }
 0x1a9   : > { %v1526_v58 = vpop.f32.mrf.mxu0  ;;  %v1750_v60 = vpop.f32.mrf.mxu1 }
 0x1aa   : > { %3858 = vst [vmem:[%s4425_s15 + $0x90] sm:$0xff] %v3654_v53   ;;  %3886 = vst [vmem:[%s4425_s15 + $0x170] sm:$0xff] %v3794_v54   ;;  %v2203_v61 = vmul.f32 %v4400_v55, %v1526_v58  ;;  %v2259_v62 = vmul.f32 %v4400_v55, %v1750_v60  ;;  %v2433_v3 = vmax.f32 %v2321_v56, 0.0  ;;  %v2489_v4 = vmax.f32 %v2377_v57, 0.0 }
 0x1ab   : > { %v1528_v63 = vpop.f32.mrf.mxu0  ;;  %v1752_v0 = vpop.f32.mrf.mxu1 }
 0x1ac   : > { %v2322_v1 = vadd.f32 %v4406_v59, %v2203_v61  ;;  %v2378_v2 = vadd.f32 %v4406_v59, %v2259_v62 }
 0x1ad   : > { %v1531_v5 = vpop.f32.mrf.mxu0  ;;  %v1755_v6 = vpop.f32.mrf.mxu1 }
 0x1ae   : > { %v2434_v7 = vmax.f32 %v2322_v1, 0.0  ;;  %v2490_v8 = vmax.f32 %v2378_v2, 0.0  ;;  %v2204_v9 = vmul.f32 %v4400_v55, %v1531_v5  ;;  %v2260_v10 = vmul.f32 %v4400_v55, %v1755_v6 }
 0x1af   : > { %v1533_v11 = vpop.f32.mrf.mxu0  ;;  %v1757_v12 = vpop.f32.mrf.mxu1 }
 0x1b0   : > { %v3659_v13 = vpack.c.bf16 %v2434_v7, %v2433_v3  ;;  %v3799_v14 = vpack.c.bf16 %v2490_v8, %v2489_v4  ;;  %v2323_v15 = vadd.f32 %v4406_v59, %v2204_v9  ;;  %v2379_v16 = vadd.f32 %v4406_v59, %v2260_v10 }
 0x1b1   : > { %v1534_v17 = vpop.f32.mrf.mxu0  ;;  %v1758_v18 = vpop.f32.mrf.mxu1 }
 0x1b2   : > { %3859 = vst [vmem:[%s4425_s15 + $0x98] sm:$0xff] %v3659_v13   ;;  %3887 = vst [vmem:[%s4425_s15 + $0x178] sm:$0xff] %v3799_v14   ;;  %v2205_v20 = vmul.f32 %v4630_v19, %v1534_v17  ;;  %v2261_v55 = vmul.f32 %v4630_v19, %v1758_v18  ;;  %v2435_v25 = vmax.f32 %v2323_v15, 0.0  ;;  %v2491_v26 = vmax.f32 %v2379_v16, 0.0 }
 0x1b3   : > { %v1536_v21 = vpop.f32.mrf.mxu0  ;;  %v1760_v22 = vpop.f32.mrf.mxu1 }
 0x1b4   : > { %v2324_v59 = vadd.f32 %v4637_v23, %v2205_v20  ;;  %v2380_v24 = vadd.f32 %v4637_v23, %v2261_v55 }
 0x1b5   : > { %v1539_v27 = vpop.f32.mrf.mxu0  ;;  %v1763_v28 = vpop.f32.mrf.mxu1 }
 0x1b6   : > { %v2436_v29 = vmax.f32 %v2324_v59, 0.0  ;;  %v2492_v30 = vmax.f32 %v2380_v24, 0.0  ;;  %v2206_v31 = vmul.f32 %v4630_v19, %v1539_v27  ;;  %v2262_v32 = vmul.f32 %v4630_v19, %v1763_v28 }
 0x1b7   : > { %v1541_v33 = vpop.f32.mrf.mxu0  ;;  %v1765_v34 = vpop.f32.mrf.mxu1 }
 0x1b8   : > { %v3664_v35 = vpack.c.bf16 %v2436_v29, %v2435_v25  ;;  %v3804_v36 = vpack.c.bf16 %v2492_v30, %v2491_v26  ;;  %v2325_v37 = vadd.f32 %v4637_v23, %v2206_v31  ;;  %v2381_v38 = vadd.f32 %v4637_v23, %v2262_v32 }
 0x1b9   : > { %v1542_v39 = vpop.f32.mrf.mxu0  ;;  %v1766_v40 = vpop.f32.mrf.mxu1 }
 0x1ba   : > { %3860 = vst [vmem:[%s4425_s15 + $0xa0] sm:$0xff] %v3664_v35   ;;  %3888 = vst [vmem:[%s4425_s15 + $0x180] sm:$0xff] %v3804_v36   ;;  %v2207_v41 = vmul.f32 %v4630_v19, %v1542_v39  ;;  %v2263_v42 = vmul.f32 %v4630_v19, %v1766_v40  ;;  %v2437_v47 = vmax.f32 %v2325_v37, 0.0  ;;  %v2493_v48 = vmax.f32 %v2381_v38, 0.0 }
 0x1bb   : > { %v1544_v43 = vpop.f32.mrf.mxu0  ;;  %v1768_v44 = vpop.f32.mrf.mxu1 }
 0x1bc   : > { %v2326_v45 = vadd.f32 %v4637_v23, %v2207_v41  ;;  %v2382_v46 = vadd.f32 %v4637_v23, %v2263_v42 }
 0x1bd   : > { %v1547_v49 = vpop.f32.mrf.mxu0  ;;  %v1771_v50 = vpop.f32.mrf.mxu1 }
 0x1be   : > { %v2438_v51 = vmax.f32 %v2326_v45, 0.0  ;;  %v2494_v52 = vmax.f32 %v2382_v46, 0.0  ;;  %v2208_v53 = vmul.f32 %v4630_v19, %v1547_v49  ;;  %v2264_v54 = vmul.f32 %v4630_v19, %v1771_v50 }
 0x1bf   : > { %v1549_v56 = vpop.f32.mrf.mxu0  ;;  %v1773_v57 = vpop.f32.mrf.mxu1 }
 0x1c0   : > { %v3669_v58 = vpack.c.bf16 %v2438_v51, %v2437_v47  ;;  %v3809_v60 = vpack.c.bf16 %v2494_v52, %v2493_v48  ;;  %v2327_v61 = vadd.f32 %v4637_v23, %v2208_v53  ;;  %v2383_v62 = vadd.f32 %v4637_v23, %v2264_v54 }
 0x1c1   : > { %v1550_v63 = vpop.f32.mrf.mxu0  ;;  %v1774_v0 = vpop.f32.mrf.mxu1 }
 0x1c2   : > { %3861 = vst [vmem:[%s4425_s15 + $0xa8] sm:$0xff] %v3669_v58   ;;  %3889 = vst [vmem:[%s4425_s15 + $0x188] sm:$0xff] %v3809_v60   ;;  %v2209_v1 = vmul.f32 %v4630_v19, %v1550_v63  ;;  %v2265_v2 = vmul.f32 %v4630_v19, %v1774_v0  ;;  %v2439_v7 = vmax.f32 %v2327_v61, 0.0  ;;  %v2495_v8 = vmax.f32 %v2383_v62, 0.0 }
 0x1c3   : > { %v1552_v3 = vpop.f32.mrf.mxu0  ;;  %v1776_v4 = vpop.f32.mrf.mxu1 }
 0x1c4   : > { %v2328_v5 = vadd.f32 %v4637_v23, %v2209_v1  ;;  %v2384_v6 = vadd.f32 %v4637_v23, %v2265_v2 }
 0x1c5   : > { %v1555_v9 = vpop.f32.mrf.mxu0  ;;  %v1779_v10 = vpop.f32.mrf.mxu1 }
 0x1c6   : > { %v2440_v11 = vmax.f32 %v2328_v5, 0.0  ;;  %v2496_v12 = vmax.f32 %v2384_v6, 0.0  ;;  %v2210_v13 = vmul.f32 %v4630_v19, %v1555_v9  ;;  %v2266_v14 = vmul.f32 %v4630_v19, %v1779_v10 }
 0x1c7   : > { %v1557_v15 = vpop.f32.mrf.mxu0  ;;  %v1781_v16 = vpop.f32.mrf.mxu1 }
 0x1c8   : > { %v3674_v17 = vpack.c.bf16 %v2440_v11, %v2439_v7  ;;  %v3814_v18 = vpack.c.bf16 %v2496_v12, %v2495_v8  ;;  %v2329_v20 = vadd.f32 %v4637_v23, %v2210_v13  ;;  %v2385_v55 = vadd.f32 %v4637_v23, %v2266_v14 }
 0x1c9   : > { %v1558_v21 = vpop.f32.mrf.mxu0  ;;  %v1782_v22 = vpop.f32.mrf.mxu1 }
 0x1ca   : > { %3862 = vst [vmem:[%s4425_s15 + $0xb0] sm:$0xff] %v3674_v17   ;;  %3890 = vst [vmem:[%s4425_s15 + $0x190] sm:$0xff] %v3814_v18   ;;  %v2211_v59 = vmul.f32 %v4630_v19, %v1558_v21  ;;  %v2267_v24 = vmul.f32 %v4630_v19, %v1782_v22  ;;  %v2441_v29 = vmax.f32 %v2329_v20, 0.0  ;;  %v2497_v30 = vmax.f32 %v2385_v55, 0.0 }
 0x1cb   : > { %v1560_v25 = vpop.f32.mrf.mxu0  ;;  %v1784_v26 = vpop.f32.mrf.mxu1 }
 0x1cc   : > { %v2330_v27 = vadd.f32 %v4637_v23, %v2211_v59  ;;  %v2386_v28 = vadd.f32 %v4637_v23, %v2267_v24 }
 0x1cd   : > { %v1563_v31 = vpop.f32.mrf.mxu0  ;;  %v1787_v32 = vpop.f32.mrf.mxu1 }
 0x1ce   : > { %v2442_v33 = vmax.f32 %v2330_v27, 0.0  ;;  %v2498_v34 = vmax.f32 %v2386_v28, 0.0  ;;  %v2212_v35 = vmul.f32 %v4630_v19, %v1563_v31  ;;  %v2268_v36 = vmul.f32 %v4630_v19, %v1787_v32 }
 0x1cf   : > { %v1565_v37 = vpop.f32.mrf.mxu0  ;;  %v1789_v38 = vpop.f32.mrf.mxu1 }
 0x1d0   : > { %v3679_v39 = vpack.c.bf16 %v2442_v33, %v2441_v29  ;;  %v3819_v40 = vpack.c.bf16 %v2498_v34, %v2497_v30  ;;  %v2331_v41 = vadd.f32 %v4637_v23, %v2212_v35  ;;  %v2387_v42 = vadd.f32 %v4637_v23, %v2268_v36 }
 0x1d1   : > { %v1566_v43 = vpop.f32.mrf.mxu0  ;;  %v1790_v44 = vpop.f32.mrf.mxu1 }
 0x1d2   : > { %3863 = vst [vmem:[%s4425_s15 + $0xb8] sm:$0xff] %v3679_v39   ;;  %3891 = vst [vmem:[%s4425_s15 + $0x198] sm:$0xff] %v3819_v40   ;;  %v2213_v45 = vmul.f32 %v4630_v19, %v1566_v43  ;;  %v2269_v46 = vmul.f32 %v4630_v19, %v1790_v44  ;;  %v2443_v51 = vmax.f32 %v2331_v41, 0.0  ;;  %v2499_v52 = vmax.f32 %v2387_v42, 0.0 }
 0x1d3   : > { %v1568_v47 = vpop.f32.mrf.mxu0  ;;  %v1792_v48 = vpop.f32.mrf.mxu1 }
 0x1d4   : > { %v2332_v49 = vadd.f32 %v4637_v23, %v2213_v45  ;;  %v2388_v50 = vadd.f32 %v4637_v23, %v2269_v46 }
 0x1d5   : > { %v1571_v53 = vpop.f32.mrf.mxu0  ;;  %v1795_v54 = vpop.f32.mrf.mxu1 }
 0x1d6   : > { %v2444_v56 = vmax.f32 %v2332_v49, 0.0  ;;  %v2500_v57 = vmax.f32 %v2388_v50, 0.0  ;;  %v2214_v58 = vmul.f32 %v4630_v19, %v1571_v53  ;;  %v2270_v60 = vmul.f32 %v4630_v19, %v1795_v54 }
 0x1d7   : > { %v1573_v61 = vpop.f32.mrf.mxu0  ;;  %v1797_v62 = vpop.f32.mrf.mxu1 }
 0x1d8   : > { %v3684_v63 = vpack.c.bf16 %v2444_v56, %v2443_v51  ;;  %v3824_v0 = vpack.c.bf16 %v2500_v57, %v2499_v52  ;;  %v2333_v1 = vadd.f32 %v4637_v23, %v2214_v58  ;;  %v2389_v2 = vadd.f32 %v4637_v23, %v2270_v60 }
 0x1d9   : > { %v1574_v3 = vpop.f32.mrf.mxu0  ;;  %v1798_v4 = vpop.f32.mrf.mxu1 }
 0x1da   : > { %3864 = vst [vmem:[%s4425_s15 + $0xc0] sm:$0xff] %v3684_v63   ;;  %3892 = vst [vmem:[%s4425_s15 + $0x1a0] sm:$0xff] %v3824_v0   ;;  %v2215_v5 = vmul.f32 %v4630_v19, %v1574_v3  ;;  %v2271_v6 = vmul.f32 %v4630_v19, %v1798_v4  ;;  %v2445_v11 = vmax.f32 %v2333_v1, 0.0  ;;  %v2501_v12 = vmax.f32 %v2389_v2, 0.0 }
 0x1db   : > { %v1576_v7 = vpop.f32.mrf.mxu0  ;;  %v1800_v8 = vpop.f32.mrf.mxu1 }
 0x1dc   : > { %v2334_v9 = vadd.f32 %v4637_v23, %v2215_v5  ;;  %v2390_v10 = vadd.f32 %v4637_v23, %v2271_v6 }
 0x1dd   : > { %v1579_v13 = vpop.f32.mrf.mxu0  ;;  %v1803_v14 = vpop.f32.mrf.mxu1 }
 0x1de   : > { %v2446_v15 = vmax.f32 %v2334_v9, 0.0  ;;  %v2502_v16 = vmax.f32 %v2390_v10, 0.0  ;;  %v2216_v17 = vmul.f32 %v4630_v19, %v1579_v13  ;;  %v2272_v18 = vmul.f32 %v4630_v19, %v1803_v14 }
 0x1df   : > { %v1581_v20 = vpop.f32.mrf.mxu0  ;;  %v1805_v55 = vpop.f32.mrf.mxu1 }
 0x1e0   : > { %v3689_v21 = vpack.c.bf16 %v2446_v15, %v2445_v11  ;;  %v3829_v22 = vpack.c.bf16 %v2502_v16, %v2501_v12  ;;  %v2335_v59 = vadd.f32 %v4637_v23, %v2216_v17  ;;  %v2391_v24 = vadd.f32 %v4637_v23, %v2272_v18 }
 0x1e1   : > { %v1582_v25 = vpop.f32.mrf.mxu0  ;;  %v1806_v26 = vpop.f32.mrf.mxu1 }
 0x1e2   : > { %3865 = vst [vmem:[%s4425_s15 + $0xc8] sm:$0xff] %v3689_v21   ;;  %3893 = vst [vmem:[%s4425_s15 + $0x1a8] sm:$0xff] %v3829_v22   ;;  %v2217_v27 = vmul.f32 %v4630_v19, %v1582_v25  ;;  %v2273_v28 = vmul.f32 %v4630_v19, %v1806_v26  ;;  %v2447_v33 = vmax.f32 %v2335_v59, 0.0  ;;  %v2503_v34 = vmax.f32 %v2391_v24, 0.0 }
 0x1e3   : > { %v1584_v29 = vpop.f32.mrf.mxu0  ;;  %v1808_v30 = vpop.f32.mrf.mxu1 }
 0x1e4   : > { %v2336_v31 = vadd.f32 %v4637_v23, %v2217_v27  ;;  %v2392_v32 = vadd.f32 %v4637_v23, %v2273_v28 }
 0x1e5   : > { %v1587_v35 = vpop.f32.mrf.mxu0  ;;  %v1811_v36 = vpop.f32.mrf.mxu1 }
 0x1e6   : > { %v2448_v37 = vmax.f32 %v2336_v31, 0.0  ;;  %v2504_v38 = vmax.f32 %v2392_v32, 0.0  ;;  %v2218_v39 = vmul.f32 %v4630_v19, %v1587_v35  ;;  %v2274_v40 = vmul.f32 %v4630_v19, %v1811_v36 }
 0x1e7   : > { %v1589_v41 = vpop.f32.mrf.mxu0  ;;  %v1813_v42 = vpop.f32.mrf.mxu1 }
 0x1e8   : > { %v3694_v43 = vpack.c.bf16 %v2448_v37, %v2447_v33  ;;  %v3834_v44 = vpack.c.bf16 %v2504_v38, %v2503_v34  ;;  %v2337_v47 = vadd.f32 %v4637_v23, %v2218_v39  ;;  %v2393_v48 = vadd.f32 %v4637_v23, %v2274_v40 }
 0x1e9   : > { %v1590_v45 = vpop.f32.mrf.mxu0  ;;  %v1814_v46 = vpop.f32.mrf.mxu1 }
 0x1ea   : > { %3866 = vst [vmem:[%s4425_s15 + $0xd0] sm:$0xff] %v3694_v43   ;;  %3894 = vst [vmem:[%s4425_s15 + $0x1b0] sm:$0xff] %v3834_v44   ;;  %v2219_v49 = vmul.f32 %v4630_v19, %v1590_v45  ;;  %v2275_v50 = vmul.f32 %v4630_v19, %v1814_v46  ;;  %v2449_v56 = vmax.f32 %v2337_v47, 0.0  ;;  %v2505_v57 = vmax.f32 %v2393_v48, 0.0 }
 0x1eb   : > { %v1592_v51 = vpop.f32.mrf.mxu0  ;;  %v1816_v52 = vpop.f32.mrf.mxu1 }
 0x1ec   : > { %v2338_v53 = vadd.f32 %v4637_v23, %v2219_v49  ;;  %v2394_v54 = vadd.f32 %v4637_v23, %v2275_v50 }
 0x1ee   : > { %v2450_v58 = vmax.f32 %v2338_v53, 0.0  ;;  %v2506_v60 = vmax.f32 %v2394_v54, 0.0 }
 0x1f0   : > { %v3699_v61 = vpack.c.bf16 %v2450_v58, %v2449_v56  ;;  %v3839_v62 = vpack.c.bf16 %v2506_v60, %v2505_v57 }
 0x1f2   : > { %3867 = vst [vmem:[%s4425_s15 + $0xd8] sm:$0xff] %v3699_v61   ;;  %3895 = vst [vmem:[%s4425_s15 + $0x1b8] sm:$0xff] %v3839_v62  }
 0x1f3 PF: > { %s14_s17 = sadd.s32 1, %s4161_s17   ;;  %s4727_s15 = smov %s4157_s16 }
 0x1f4   : > { %p11_p5 = scmp.ge.s32.totalorder %s14_s17, 16   ;;  %s4728_s16 = smov %s4730_s18 }
 0x1f6   :  { %13 = sbr.rel (!%p11_p5) target bundleno = 2 (0x2), region = 83 }

</bundles_post_ra>
